<compile_context>
chip_gen: v7x
topology: tpu7x:2x2x1
jax: 0.10.0
libtpu: 0.0.40
codegen_flags: <defaults>
</compile_context>

<pallas_src>
import math
import functools

import jax
import jax.numpy as jnp
from jax import lax
from jax.experimental import pallas as pl
from jax.experimental.pallas import tpu as pltpu


# ----------------------------------------------------------------------------
# Helpers
# ----------------------------------------------------------------------------
def make_positional_embedding(seq_len, d_model):
    pos = jnp.arange(seq_len, dtype=jnp.float32)[:, None]
    div = jnp.exp(jnp.arange(0, d_model, 2, dtype=jnp.float32)
                  * (-math.log(10000.0) / d_model))
    pe = jnp.zeros((seq_len, d_model), jnp.float32)
    pe = pe.at[:, 0::2].set(jnp.sin(pos * div))
    pe = pe.at[:, 1::2].set(jnp.cos(pos * div))
    return pe


def _layernorm(x, g, b, eps=1e-5):
    mu = jnp.mean(x, axis=-1, keepdims=True)
    xc = x - mu
    var = jnp.mean(xc * xc, axis=-1, keepdims=True)
    return xc * lax.rsqrt(var + eps) * g + b


def _gelu_exact(x):
    # nn.GELU default (erf form)
    return 0.5 * x * (1.0 + lax.erf(x * (1.0 / math.sqrt(2.0))))


# ----------------------------------------------------------------------------
# Fused transformer + generator kernel (one pallas_call for the whole stack)
# ----------------------------------------------------------------------------
def base_transformer_forward(params, inp, spec, *, heads, dim_head, num_pred):
    b, L, F = inp.shape
    C = params["spec_w"].shape[0]
    dim = params["emb_w"].shape[1]
    inner = heads * dim_head
    fc_dim = params["w1"].shape[2]
    depth = params["wqkv"].shape[0]
    dh = dim_head
    n = num_pred + L + C          # tokens per batch element
    M = b * n                     # flattened activation rows
    scale = dim_head ** (-0.5)

    # ---- token assembly in plain XLA (tiny; not worth extra pallas launches) ----
    emb = jnp.dot(inp.reshape(b * L, F), params["emb_w"]) + params["emb_b"]
    emb = emb.reshape(b, L, dim) + params["pe"][None, :, :]
    pred = jnp.broadcast_to(params["pred_token"][None], (b, num_pred, dim))
    se = spec[:, :, None] * params["spec_w"][None] + params["spec_b"][None]
    x0 = jnp.concatenate([pred, emb, se], axis=1).reshape(M, dim)
    # (emb_dropout / dropout are identity at inference)

    def kernel(x0_ref,
               ln1g_ref, ln1b_ref, wqkv_ref, wo_ref, bo_ref,
               ln2g_ref, ln2b_ref, w1_ref, b1_ref, w2_ref, b2_ref,
               gw1_ref, gb1_ref, glng_ref, glnb_ref, gw2_ref, gb2_ref,
               out_ref, x_scratch):
        d = pl.program_id(0)

        # Load the assembled tokens into the resident VMEM slab once.
        @pl.when(d == 0)
        def _load_tokens():
            x_scratch[...] = x0_ref[...]

        x = x_scratch[...]                                     # (M, dim)

        # ---- PreNorm multi-head self-attention + residual ----
        xn = _layernorm(x, ln1g_ref[0], ln1b_ref[0])
        qkv = jnp.dot(xn, wqkv_ref[0],
                      preferred_element_type=jnp.float32)      # (M, 3*inner)
        wo_l = wo_ref[0]                                       # (inner, dim)
        bo_l = bo_ref[0]                                       # (1, dim)
        for bi in range(b):
            r0 = bi * n
            acc = bo_l                                         # Wo-projected heads + bias
            for h in range(heads):
                c0 = h * dh
                qh = qkv[r0:r0 + n, c0:c0 + dh]                # (n, dh)
                kh = qkv[r0:r0 + n, inner + c0:inner + c0 + dh]
                vh = qkv[r0:r0 + n, 2 * inner + c0:2 * inner + c0 + dh]
                # q @ k^T without materializing a transposed copy of K
                s = lax.dot_general(qh, kh, (((1,), (1,)), ((), ())),
                                    preferred_element_type=jnp.float32) * scale
                m = jnp.max(s, axis=-1, keepdims=True)
                p = jnp.exp(s - m)
                p = p * pl.reciprocal(jnp.sum(p, axis=-1, keepdims=True),
                                      approx=True)
                oh = jnp.dot(p, vh,
                             preferred_element_type=jnp.float32)       # (n, dh)
                acc = acc + jnp.dot(oh, wo_l[c0:c0 + dh, :],
                                    preferred_element_type=jnp.float32)  # (n, dim)
            x_scratch[r0:r0 + n, :] = x[r0:r0 + n, :] + acc

        x_mid = x_scratch[...]

        # ---- PreNorm feed-forward + residual ----
        xn2 = _layernorm(x_mid, ln2g_ref[0], ln2b_ref[0])
        h1 = jnp.dot(xn2, w1_ref[0],
                     preferred_element_type=jnp.float32) + b1_ref[0]
        h1 = _gelu_exact(h1)
        h2 = jnp.dot(h1, w2_ref[0],
                     preferred_element_type=jnp.float32) + b2_ref[0]
        x_new = x_mid + h2
        x_scratch[...] = x_new

        # ---- generator head on the pred tokens (last layer only) ----
        @pl.when(d == pl.num_programs(0) - 1)
        def _generator():
            for bi in range(b):
                xp = x_new[bi * n:bi * n + num_pred, :]        # (num_pred, dim)
                y = gb1_ref[...]                               # (1, dim)
                for p_idx in range(num_pred):
                    y = y + jnp.dot(xp[p_idx:p_idx + 1, :], gw1_ref[p_idx],
                                    preferred_element_type=jnp.float32)
                y = jnp.maximum(y, 0.0)
                y = _layernorm(y, glng_ref[...], glnb_ref[...])
                row = jnp.dot(y, gw2_ref[...],
                              preferred_element_type=jnp.float32) + gb2_ref[...]
                out_ref[pl.ds(bi, 1), :] = row.astype(out_ref.dtype)

    per_layer = lambda d: (d, 0, 0)
    fixed2 = lambda d: (0, 0)
    fixed3 = lambda d: (0, 0, 0)

    grid_spec = pltpu.PrefetchScalarGridSpec(
        num_scalar_prefetch=0,
        grid=(depth,),
        in_specs=[
            pl.BlockSpec((M, dim), fixed2),                    # assembled tokens
            pl.BlockSpec((1, 1, dim), per_layer),              # ln1_g
            pl.BlockSpec((1, 1, dim), per_layer),              # ln1_b
            pl.BlockSpec((1, dim, 3 * inner), per_layer),      # wqkv (no bias)
            pl.BlockSpec((1, inner, dim), per_layer),          # wo
            pl.BlockSpec((1, 1, dim), per_layer),              # bo
            pl.BlockSpec((1, 1, dim), per_layer),              # ln2_g
            pl.BlockSpec((1, 1, dim), per_layer),              # ln2_b
            pl.BlockSpec((1, dim, fc_dim), per_layer),         # w1
            pl.BlockSpec((1, 1, fc_dim), per_layer),           # b1
            pl.BlockSpec((1, fc_dim, dim), per_layer),         # w2
            pl.BlockSpec((1, 1, dim), per_layer),              # b2
            pl.BlockSpec((num_pred, dim, dim), fixed3),        # gen_w1 (reshaped)
            pl.BlockSpec((1, dim), fixed2),                    # gen_b1
            pl.BlockSpec((1, dim), fixed2),                    # gen_ln_g
            pl.BlockSpec((1, dim), fixed2),                    # gen_ln_b
            pl.BlockSpec((dim, num_pred), fixed2),             # gen_w2
            pl.BlockSpec((1, num_pred), fixed2),               # gen_b2
        ],
        out_specs=pl.BlockSpec((b, num_pred), fixed2),
        scratch_shapes=[pltpu.VMEM((M, dim), jnp.float32)],    # resident activations
    )

    return pl.pallas_call(
        kernel,
        grid_spec=grid_spec,
        out_shape=jax.ShapeDtypeStruct((b, num_pred), jnp.float32),
        compiler_params=pltpu.CompilerParams(
            dimension_semantics=("arbitrary",),                # layers are sequential
            vmem_limit_bytes=32 * 1024 * 1024),
    )(x0,
      params["ln1_g"], params["ln1_b"], params["wqkv"], params["wo"],
      params["bo"], params["ln2_g"], params["ln2_b"], params["w1"],
      params["b1"], params["w2"], params["b2"],
      params["gen_w1"], params["gen_b1"], params["gen_ln_g"],
      params["gen_ln_b"], params["gen_w2"], params["gen_b2"])


# ----------------------------------------------------------------------------
# Parameter init (weights stacked over depth for per-layer streaming)
# ----------------------------------------------------------------------------
def init_params(key, *, num_all, num_control, num_pred, dim, depth,
                heads, dim_head, fc_dim, look_back):
    inner = heads * dim_head
    keys = jax.random.split(key, 32)
    it = iter(keys)

    def nrm(shape, scale=0.02):
        return scale * jax.random.normal(next(it), shape, jnp.float32)

    params = {
        "emb_w": nrm((num_all, dim)), "emb_b": nrm((1, dim)),
        "pred_token": nrm((num_pred, dim)),
        "spec_w": nrm((num_control, dim)), "spec_b": nrm((num_control, dim)),
        # transformer layers, stacked over depth
        "ln1_g": jnp.ones((depth, 1, dim), jnp.float32),
        "ln1_b": jnp.zeros((depth, 1, dim), jnp.float32),
        "wqkv": nrm((depth, dim, 3 * inner)),                  # bias=False
        "wo": nrm((depth, inner, dim)), "bo": nrm((depth, 1, dim)),
        "ln2_g": jnp.ones((depth, 1, dim), jnp.float32),
        "ln2_b": jnp.zeros((depth, 1, dim), jnp.float32),
        "w1": nrm((depth, dim, fc_dim)), "b1": nrm((depth, 1, fc_dim)),
        "w2": nrm((depth, fc_dim, dim)), "b2": nrm((depth, 1, dim)),
        # generator head; gen_w1 pre-reshaped (num_pred*dim, dim) -> (num_pred, dim, dim)
        "gen_w1": nrm((num_pred, dim, dim)), "gen_b1": nrm((1, dim)),
        "gen_ln_g": jnp.ones((1, dim), jnp.float32),
        "gen_ln_b": jnp.zeros((1, dim), jnp.float32),
        "gen_w2": nrm((dim, num_pred)), "gen_b2": nrm((1, num_pred)),
        # positional embedding precomputed once (buffer, not trained)
        "pe": make_positional_embedding(look_back, dim),
    }
    return params


# ----------------------------------------------------------------------------
# Demo
# ----------------------------------------------------------------------------
if __name__ == "__main__":
    NUM_CONTROL_FEATURES = 4
    NUM_PRED_FEATURES = 4
    NUM_ALL_FEATURES = 8
    LOOK_BACK = 8
    DIM = 32
    DEPTH = 2
    HEADS = 4
    DIM_HEAD = 8
    FC_DIM = 64
    BATCH = 2

    key = jax.random.PRNGKey(0)
    k_param, k_in, k_spec = jax.random.split(key, 3)

    params = init_params(
        k_param,
        num_all=NUM_ALL_FEATURES, num_control=NUM_CONTROL_FEATURES,
        num_pred=NUM_PRED_FEATURES, dim=DIM, depth=DEPTH,
        heads=HEADS, dim_head=DIM_HEAD, fc_dim=FC_DIM, look_back=LOOK_BACK,
    )

    inp = jax.random.normal(k_in, (BATCH, LOOK_BACK, NUM_ALL_FEATURES), jnp.float32)
    spec = jax.random.normal(k_spec, (BATCH, NUM_CONTROL_FEATURES), jnp.float32)

    forward = jax.jit(functools.partial(
        base_transformer_forward,
        heads=HEADS, dim_head=DIM_HEAD, num_pred=NUM_PRED_FEATURES))

    out = forward(params, inp, spec)
    out = jax.block_until_ready(out)
    assert out.shape == (BATCH, NUM_PRED_FEATURES)
    assert bool(jnp.all(jnp.isfinite(out)))
    print("KERNEL_OK")
</pallas_src>

<mosaic_0001>
module attributes {stable_mosaic.version = 11 : i64} {
  func.func @kernel(%arg0: i32, %arg1: memref<32x32xf32, #tpu.memory_space<vmem>>, %arg2: memref<1x1x32xf32, #tpu.memory_space<vmem>>, %arg3: memref<1x1x32xf32, #tpu.memory_space<vmem>>, %arg4: memref<1x32x96xf32, #tpu.memory_space<vmem>>, %arg5: memref<1x32x32xf32, #tpu.memory_space<vmem>>, %arg6: memref<1x1x32xf32, #tpu.memory_space<vmem>>, %arg7: memref<1x1x32xf32, #tpu.memory_space<vmem>>, %arg8: memref<1x1x32xf32, #tpu.memory_space<vmem>>, %arg9: memref<1x32x64xf32, #tpu.memory_space<vmem>>, %arg10: memref<1x1x64xf32, #tpu.memory_space<vmem>>, %arg11: memref<1x64x32xf32, #tpu.memory_space<vmem>>, %arg12: memref<1x1x32xf32, #tpu.memory_space<vmem>>, %arg13: memref<4x32x32xf32, #tpu.memory_space<vmem>>, %arg14: memref<1x32xf32, #tpu.memory_space<vmem>>, %arg15: memref<1x32xf32, #tpu.memory_space<vmem>>, %arg16: memref<1x32xf32, #tpu.memory_space<vmem>>, %arg17: memref<32x4xf32, #tpu.memory_space<vmem>>, %arg18: memref<1x4xf32, #tpu.memory_space<vmem>>, %arg19: memref<2x4xf32, #tpu.memory_space<vmem>>, %arg20: memref<32x32xf32, #tpu.memory_space<vmem>>) attributes {dimension_semantics = [#tpu.dimension_semantics<arbitrary>], iteration_bounds = array<i64: 2>, scalar_prefetch = 0 : i64, scratch_operands = 1 : i64, tpu.core_type = #tpu.core_type<tc>, window_params = [{pipeline_mode = #tpu.pipeline_mode<synchronous>, transform_indices = @transform_0, window_bounds = array<i64: 32, 32>}, {transform_indices = @transform_1, window_bounds = array<i64: 1, 1, 32>}, {transform_indices = @transform_2, window_bounds = array<i64: 1, 1, 32>}, {transform_indices = @transform_3, window_bounds = array<i64: 1, 32, 96>}, {transform_indices = @transform_4, window_bounds = array<i64: 1, 32, 32>}, {transform_indices = @transform_5, window_bounds = array<i64: 1, 1, 32>}, {transform_indices = @transform_6, window_bounds = array<i64: 1, 1, 32>}, {transform_indices = @transform_7, window_bounds = array<i64: 1, 1, 32>}, {transform_indices = @transform_8, window_bounds = array<i64: 1, 32, 64>}, {transform_indices = @transform_9, window_bounds = array<i64: 1, 1, 64>}, {transform_indices = @transform_10, window_bounds = array<i64: 1, 64, 32>}, {transform_indices = @transform_11, window_bounds = array<i64: 1, 1, 32>}, {pipeline_mode = #tpu.pipeline_mode<synchronous>, transform_indices = @transform_12, window_bounds = array<i64: 4, 32, 32>}, {pipeline_mode = #tpu.pipeline_mode<synchronous>, transform_indices = @transform_13, window_bounds = array<i64: 1, 32>}, {pipeline_mode = #tpu.pipeline_mode<synchronous>, transform_indices = @transform_14, window_bounds = array<i64: 1, 32>}, {pipeline_mode = #tpu.pipeline_mode<synchronous>, transform_indices = @transform_15, window_bounds = array<i64: 1, 32>}, {pipeline_mode = #tpu.pipeline_mode<synchronous>, transform_indices = @transform_16, window_bounds = array<i64: 32, 4>}, {pipeline_mode = #tpu.pipeline_mode<synchronous>, transform_indices = @transform_17, window_bounds = array<i64: 1, 4>}, {pipeline_mode = #tpu.pipeline_mode<synchronous>, transform_indices = @transform_18, window_bounds = array<i64: 2, 4>}]} {
    %c0_i32 = arith.constant 0 : i32
    %0 = arith.cmpi eq, %arg0, %c0_i32 : i32
    %1 = arith.extui %0 : i1 to i32
    %c0_i32_0 = arith.constant 0 : i32
    %2 = arith.cmpi ne, %1, %c0_i32_0 : i32
    scf.if %2 {
      %c0_106 = arith.constant 0 : index
      %c0_107 = arith.constant 0 : index
      %255 = vector.load %arg1[%c0_106, %c0_107] : memref<32x32xf32, #tpu.memory_space<vmem>>, vector<32x32xf32>
      %c0_108 = arith.constant 0 : index
      %c0_109 = arith.constant 0 : index
      %256 = vector.load %arg20[%c0_108, %c0_109] : memref<32x32xf32, #tpu.memory_space<vmem>>, vector<32x32xf32>
      tpu.vector_store %arg20[%c0_108, %c0_109], %255 {strides = array<i32>} : memref<32x32xf32, #tpu.memory_space<vmem>>, vector<32x32xf32>,
    } else {
    }
    %c0 = arith.constant 0 : index
    %c0_1 = arith.constant 0 : index
    %3 = vector.load %arg20[%c0, %c0_1] : memref<32x32xf32, #tpu.memory_space<vmem>>, vector<32x32xf32>
    %c0_2 = arith.constant 0 : index
    %c0_3 = arith.constant 0 : index
    %c0_4 = arith.constant 0 : index
    %4 = vector.load %arg2[%c0_2, %c0_3, %c0_4] : memref<1x1x32xf32, #tpu.memory_space<vmem>>, vector<1x1x32xf32>
    %5 = vector.shape_cast %4 : vector<1x1x32xf32> to vector<1x32xf32>
    %c0_5 = arith.constant 0 : index
    %c0_6 = arith.constant 0 : index
    %c0_7 = arith.constant 0 : index
    %6 = vector.load %arg3[%c0_5, %c0_6, %c0_7] : memref<1x1x32xf32, #tpu.memory_space<vmem>>, vector<1x1x32xf32>
    %7 = vector.shape_cast %6 : vector<1x1x32xf32> to vector<1x32xf32>
    %cst = arith.constant dense<0.000000e+00> : vector<32xf32>
    %8 = vector.multi_reduction <add>, %3, %cst [1] : vector<32x32xf32> to vector<32xf32>
    %9 = vector.shape_cast %8 : vector<32xf32> to vector<32x1xf32>
    %cst_8 = arith.constant 3.200000e+01 : f32
    %10 = vector.broadcast %cst_8 : f32 to vector<32x1xf32>
    %11 = arith.divf %9, %10 : vector<32x1xf32>
    %12 = vector.broadcast %11 : vector<32x1xf32> to vector<32x32xf32>
    %13 = arith.subf %3, %12 : vector<32x32xf32>
    %14 = arith.mulf %13, %13 : vector<32x32xf32>
    %cst_9 = arith.constant dense<0.000000e+00> : vector<32xf32>
    %15 = vector.multi_reduction <add>, %14, %cst_9 [1] : vector<32x32xf32> to vector<32xf32>
    %16 = vector.shape_cast %15 : vector<32xf32> to vector<32x1xf32>
    %cst_10 = arith.constant 3.200000e+01 : f32
    %17 = vector.broadcast %cst_10 : f32 to vector<32x1xf32>
    %18 = arith.divf %16, %17 : vector<32x1xf32>
    %cst_11 = arith.constant 9.99999974E-6 : f32
    %19 = vector.broadcast %cst_11 : f32 to vector<32x1xf32>
    %20 = arith.addf %18, %19 : vector<32x1xf32>
    %21 = math.rsqrt %20 : vector<32x1xf32>
    %22 = vector.broadcast %21 : vector<32x1xf32> to vector<32x32xf32>
    %23 = arith.mulf %13, %22 : vector<32x32xf32>
    %24 = vector.broadcast %5 : vector<1x32xf32> to vector<32x32xf32>
    %25 = arith.mulf %23, %24 : vector<32x32xf32>
    %26 = vector.broadcast %7 : vector<1x32xf32> to vector<32x32xf32>
    %27 = arith.addf %25, %26 : vector<32x32xf32>
    %c0_12 = arith.constant 0 : index
    %c0_13 = arith.constant 0 : index
    %c0_14 = arith.constant 0 : index
    %28 = vector.load %arg4[%c0_12, %c0_13, %c0_14] : memref<1x32x96xf32, #tpu.memory_space<vmem>>, vector<1x32x96xf32>
    %29 = vector.shape_cast %28 : vector<1x32x96xf32> to vector<32x96xf32>
    %cst_15 = arith.constant dense<0.000000e+00> : vector<32x96xf32>
    %30 = tpu.matmul %27, %29, %cst_15 {dimension_numbers = #tpu.dot_dimension_numbers<[1], [0], [0], [1], [0, 0, 1, 1], [], []>} : vector<32x32xf32>, vector<32x96xf32>, vector<32x96xf32> -> vector<32x96xf32>
    %c0_16 = arith.constant 0 : index
    %c0_17 = arith.constant 0 : index
    %c0_18 = arith.constant 0 : index
    %31 = vector.load %arg5[%c0_16, %c0_17, %c0_18] : memref<1x32x32xf32, #tpu.memory_space<vmem>>, vector<1x32x32xf32>
    %32 = vector.shape_cast %31 : vector<1x32x32xf32> to vector<32x32xf32>
    %c0_19 = arith.constant 0 : index
    %c0_20 = arith.constant 0 : index
    %c0_21 = arith.constant 0 : index
    %33 = vector.load %arg6[%c0_19, %c0_20, %c0_21] : memref<1x1x32xf32, #tpu.memory_space<vmem>>, vector<1x1x32xf32>
    %34 = vector.shape_cast %33 : vector<1x1x32xf32> to vector<1x32xf32>
    %35 = vector.extract_strided_slice %30 {offsets = [0, 0], sizes = [16, 8], strides = [1, 1]} : vector<32x96xf32> to vector<16x8xf32>
    %36 = vector.extract_strided_slice %30 {offsets = [0, 32], sizes = [16, 8], strides = [1, 1]} : vector<32x96xf32> to vector<16x8xf32>
    %37 = vector.extract_strided_slice %30 {offsets = [0, 64], sizes = [16, 8], strides = [1, 1]} : vector<32x96xf32> to vector<16x8xf32>
    %cst_22 = arith.constant dense<0.000000e+00> : vector<16x16xf32>
    %38 = tpu.matmul %35, %36, %cst_22 {dimension_numbers = #tpu.dot_dimension_numbers<[1], [1], [0], [0], [0, 0, 1, 0], [], []>} : vector<16x8xf32>, vector<16x8xf32>, vector<16x16xf32> -> vector<16x16xf32>
    %cst_23 = arith.constant 0.353553385 : f32
    %39 = vector.broadcast %cst_23 : f32 to vector<16x16xf32>
    %40 = arith.mulf %38, %39 : vector<16x16xf32>
    %cst_24 = arith.constant dense<0xFF800000> : vector<16xf32>
    %41 = vector.multi_reduction <maximumf>, %40, %cst_24 [1] : vector<16x16xf32> to vector<16xf32>
    %42 = vector.shape_cast %41 : vector<16xf32> to vector<16x1xf32>
    %43 = vector.broadcast %42 : vector<16x1xf32> to vector<16x16xf32>
    %44 = arith.subf %40, %43 : vector<16x16xf32>
    %45 = math.exp %44 : vector<16x16xf32>
    %cst_25 = arith.constant dense<0.000000e+00> : vector<16xf32>
    %46 = vector.multi_reduction <add>, %45, %cst_25 [1] : vector<16x16xf32> to vector<16xf32>
    %47 = vector.shape_cast %46 : vector<16xf32> to vector<16x1xf32>
    %48 = tpu.reciprocal %47 {approx = true} : vector<16x1xf32> -> vector<16x1xf32>
    %49 = vector.broadcast %48 : vector<16x1xf32> to vector<16x16xf32>
    %50 = arith.mulf %45, %49 : vector<16x16xf32>
    %cst_26 = arith.constant dense<0.000000e+00> : vector<16x8xf32>
    %51 = tpu.matmul %50, %37, %cst_26 {dimension_numbers = #tpu.dot_dimension_numbers<[1], [0], [0], [1], [0, 0, 1, 1], [], []>} : vector<16x16xf32>, vector<16x8xf32>, vector<16x8xf32> -> vector<16x8xf32>
    %52 = vector.extract_strided_slice %32 {offsets = [0, 0], sizes = [8, 32], strides = [1, 1]} : vector<32x32xf32> to vector<8x32xf32>
    %cst_27 = arith.constant dense<0.000000e+00> : vector<16x32xf32>
    %53 = tpu.matmul %51, %52, %cst_27 {dimension_numbers = #tpu.dot_dimension_numbers<[1], [0], [0], [1], [0, 0, 1, 1], [], []>} : vector<16x8xf32>, vector<8x32xf32>, vector<16x32xf32> -> vector<16x32xf32>
    %54 = vector.broadcast %34 : vector<1x32xf32> to vector<16x32xf32>
    %55 = arith.addf %54, %53 : vector<16x32xf32>
    %56 = vector.extract_strided_slice %30 {offsets = [0, 8], sizes = [16, 8], strides = [1, 1]} : vector<32x96xf32> to vector<16x8xf32>
    %57 = vector.extract_strided_slice %30 {offsets = [0, 40], sizes = [16, 8], strides = [1, 1]} : vector<32x96xf32> to vector<16x8xf32>
    %58 = vector.extract_strided_slice %30 {offsets = [0, 72], sizes = [16, 8], strides = [1, 1]} : vector<32x96xf32> to vector<16x8xf32>
    %cst_28 = arith.constant dense<0.000000e+00> : vector<16x16xf32>
    %59 = tpu.matmul %56, %57, %cst_28 {dimension_numbers = #tpu.dot_dimension_numbers<[1], [1], [0], [0], [0, 0, 1, 0], [], []>} : vector<16x8xf32>, vector<16x8xf32>, vector<16x16xf32> -> vector<16x16xf32>
    %cst_29 = arith.constant 0.353553385 : f32
    %60 = vector.broadcast %cst_29 : f32 to vector<16x16xf32>
    %61 = arith.mulf %59, %60 : vector<16x16xf32>
    %cst_30 = arith.constant dense<0xFF800000> : vector<16xf32>
    %62 = vector.multi_reduction <maximumf>, %61, %cst_30 [1] : vector<16x16xf32> to vector<16xf32>
    %63 = vector.shape_cast %62 : vector<16xf32> to vector<16x1xf32>
    %64 = vector.broadcast %63 : vector<16x1xf32> to vector<16x16xf32>
    %65 = arith.subf %61, %64 : vector<16x16xf32>
    %66 = math.exp %65 : vector<16x16xf32>
    %cst_31 = arith.constant dense<0.000000e+00> : vector<16xf32>
    %67 = vector.multi_reduction <add>, %66, %cst_31 [1] : vector<16x16xf32> to vector<16xf32>
    %68 = vector.shape_cast %67 : vector<16xf32> to vector<16x1xf32>
    %69 = tpu.reciprocal %68 {approx = true} : vector<16x1xf32> -> vector<16x1xf32>
    %70 = vector.broadcast %69 : vector<16x1xf32> to vector<16x16xf32>
    %71 = arith.mulf %66, %70 : vector<16x16xf32>
    %cst_32 = arith.constant dense<0.000000e+00> : vector<16x8xf32>
    %72 = tpu.matmul %71, %58, %cst_32 {dimension_numbers = #tpu.dot_dimension_numbers<[1], [0], [0], [1], [0, 0, 1, 1], [], []>} : vector<16x16xf32>, vector<16x8xf32>, vector<16x8xf32> -> vector<16x8xf32>
    %73 = vector.extract_strided_slice %32 {offsets = [8, 0], sizes = [8, 32], strides = [1, 1]} : vector<32x32xf32> to vector<8x32xf32>
    %cst_33 = arith.constant dense<0.000000e+00> : vector<16x32xf32>
    %74 = tpu.matmul %72, %73, %cst_33 {dimension_numbers = #tpu.dot_dimension_numbers<[1], [0], [0], [1], [0, 0, 1, 1], [], []>} : vector<16x8xf32>, vector<8x32xf32>, vector<16x32xf32> -> vector<16x32xf32>
    %75 = arith.addf %55, %74 : vector<16x32xf32>
    %76 = vector.extract_strided_slice %30 {offsets = [0, 16], sizes = [16, 8], strides = [1, 1]} : vector<32x96xf32> to vector<16x8xf32>
    %77 = vector.extract_strided_slice %30 {offsets = [0, 48], sizes = [16, 8], strides = [1, 1]} : vector<32x96xf32> to vector<16x8xf32>
    %78 = vector.extract_strided_slice %30 {offsets = [0, 80], sizes = [16, 8], strides = [1, 1]} : vector<32x96xf32> to vector<16x8xf32>
    %cst_34 = arith.constant dense<0.000000e+00> : vector<16x16xf32>
    %79 = tpu.matmul %76, %77, %cst_34 {dimension_numbers = #tpu.dot_dimension_numbers<[1], [1], [0], [0], [0, 0, 1, 0], [], []>} : vector<16x8xf32>, vector<16x8xf32>, vector<16x16xf32> -> vector<16x16xf32>
    %cst_35 = arith.constant 0.353553385 : f32
    %80 = vector.broadcast %cst_35 : f32 to vector<16x16xf32>
    %81 = arith.mulf %79, %80 : vector<16x16xf32>
    %cst_36 = arith.constant dense<0xFF800000> : vector<16xf32>
    %82 = vector.multi_reduction <maximumf>, %81, %cst_36 [1] : vector<16x16xf32> to vector<16xf32>
    %83 = vector.shape_cast %82 : vector<16xf32> to vector<16x1xf32>
    %84 = vector.broadcast %83 : vector<16x1xf32> to vector<16x16xf32>
    %85 = arith.subf %81, %84 : vector<16x16xf32>
    %86 = math.exp %85 : vector<16x16xf32>
    %cst_37 = arith.constant dense<0.000000e+00> : vector<16xf32>
    %87 = vector.multi_reduction <add>, %86, %cst_37 [1] : vector<16x16xf32> to vector<16xf32>
    %88 = vector.shape_cast %87 : vector<16xf32> to vector<16x1xf32>
    %89 = tpu.reciprocal %88 {approx = true} : vector<16x1xf32> -> vector<16x1xf32>
    %90 = vector.broadcast %89 : vector<16x1xf32> to vector<16x16xf32>
    %91 = arith.mulf %86, %90 : vector<16x16xf32>
    %cst_38 = arith.constant dense<0.000000e+00> : vector<16x8xf32>
    %92 = tpu.matmul %91, %78, %cst_38 {dimension_numbers = #tpu.dot_dimension_numbers<[1], [0], [0], [1], [0, 0, 1, 1], [], []>} : vector<16x16xf32>, vector<16x8xf32>, vector<16x8xf32> -> vector<16x8xf32>
    %93 = vector.extract_strided_slice %32 {offsets = [16, 0], sizes = [8, 32], strides = [1, 1]} : vector<32x32xf32> to vector<8x32xf32>
    %cst_39 = arith.constant dense<0.000000e+00> : vector<16x32xf32>
    %94 = tpu.matmul %92, %93, %cst_39 {dimension_numbers = #tpu.dot_dimension_numbers<[1], [0], [0], [1], [0, 0, 1, 1], [], []>} : vector<16x8xf32>, vector<8x32xf32>, vector<16x32xf32> -> vector<16x32xf32>
    %95 = arith.addf %75, %94 : vector<16x32xf32>
    %96 = vector.extract_strided_slice %30 {offsets = [0, 24], sizes = [16, 8], strides = [1, 1]} : vector<32x96xf32> to vector<16x8xf32>
    %97 = vector.extract_strided_slice %30 {offsets = [0, 56], sizes = [16, 8], strides = [1, 1]} : vector<32x96xf32> to vector<16x8xf32>
    %98 = vector.extract_strided_slice %30 {offsets = [0, 88], sizes = [16, 8], strides = [1, 1]} : vector<32x96xf32> to vector<16x8xf32>
    %cst_40 = arith.constant dense<0.000000e+00> : vector<16x16xf32>
    %99 = tpu.matmul %96, %97, %cst_40 {dimension_numbers = #tpu.dot_dimension_numbers<[1], [1], [0], [0], [0, 0, 1, 0], [], []>} : vector<16x8xf32>, vector<16x8xf32>, vector<16x16xf32> -> vector<16x16xf32>
    %cst_41 = arith.constant 0.353553385 : f32
    %100 = vector.broadcast %cst_41 : f32 to vector<16x16xf32>
    %101 = arith.mulf %99, %100 : vector<16x16xf32>
    %cst_42 = arith.constant dense<0xFF800000> : vector<16xf32>
    %102 = vector.multi_reduction <maximumf>, %101, %cst_42 [1] : vector<16x16xf32> to vector<16xf32>
    %103 = vector.shape_cast %102 : vector<16xf32> to vector<16x1xf32>
    %104 = vector.broadcast %103 : vector<16x1xf32> to vector<16x16xf32>
    %105 = arith.subf %101, %104 : vector<16x16xf32>
    %106 = math.exp %105 : vector<16x16xf32>
    %cst_43 = arith.constant dense<0.000000e+00> : vector<16xf32>
    %107 = vector.multi_reduction <add>, %106, %cst_43 [1] : vector<16x16xf32> to vector<16xf32>
    %108 = vector.shape_cast %107 : vector<16xf32> to vector<16x1xf32>
    %109 = tpu.reciprocal %108 {approx = true} : vector<16x1xf32> -> vector<16x1xf32>
    %110 = vector.broadcast %109 : vector<16x1xf32> to vector<16x16xf32>
    %111 = arith.mulf %106, %110 : vector<16x16xf32>
    %cst_44 = arith.constant dense<0.000000e+00> : vector<16x8xf32>
    %112 = tpu.matmul %111, %98, %cst_44 {dimension_numbers = #tpu.dot_dimension_numbers<[1], [0], [0], [1], [0, 0, 1, 1], [], []>} : vector<16x16xf32>, vector<16x8xf32>, vector<16x8xf32> -> vector<16x8xf32>
    %113 = vector.extract_strided_slice %32 {offsets = [24, 0], sizes = [8, 32], strides = [1, 1]} : vector<32x32xf32> to vector<8x32xf32>
    %cst_45 = arith.constant dense<0.000000e+00> : vector<16x32xf32>
    %114 = tpu.matmul %112, %113, %cst_45 {dimension_numbers = #tpu.dot_dimension_numbers<[1], [0], [0], [1], [0, 0, 1, 1], [], []>} : vector<16x8xf32>, vector<8x32xf32>, vector<16x32xf32> -> vector<16x32xf32>
    %115 = arith.addf %95, %114 : vector<16x32xf32>
    %116 = vector.extract_strided_slice %3 {offsets = [0, 0], sizes = [16, 32], strides = [1, 1]} : vector<32x32xf32> to vector<16x32xf32>
    %117 = arith.addf %116, %115 : vector<16x32xf32>
    %c0_46 = arith.constant 0 : index
    %c0_47 = arith.constant 0 : index
    %118 = vector.load %arg20[%c0_46, %c0_47] : memref<32x32xf32, #tpu.memory_space<vmem>>, vector<16x32xf32>
    tpu.vector_store %arg20[%c0_46, %c0_47], %117 {strides = array<i32>} : memref<32x32xf32, #tpu.memory_space<vmem>>, vector<16x32xf32>,
    %119 = vector.extract_strided_slice %30 {offsets = [16, 0], sizes = [16, 8], strides = [1, 1]} : vector<32x96xf32> to vector<16x8xf32>
    %120 = vector.extract_strided_slice %30 {offsets = [16, 32], sizes = [16, 8], strides = [1, 1]} : vector<32x96xf32> to vector<16x8xf32>
    %121 = vector.extract_strided_slice %30 {offsets = [16, 64], sizes = [16, 8], strides = [1, 1]} : vector<32x96xf32> to vector<16x8xf32>
    %cst_48 = arith.constant dense<0.000000e+00> : vector<16x16xf32>
    %122 = tpu.matmul %119, %120, %cst_48 {dimension_numbers = #tpu.dot_dimension_numbers<[1], [1], [0], [0], [0, 0, 1, 0], [], []>} : vector<16x8xf32>, vector<16x8xf32>, vector<16x16xf32> -> vector<16x16xf32>
    %cst_49 = arith.constant 0.353553385 : f32
    %123 = vector.broadcast %cst_49 : f32 to vector<16x16xf32>
    %124 = arith.mulf %122, %123 : vector<16x16xf32>
    %cst_50 = arith.constant dense<0xFF800000> : vector<16xf32>
    %125 = vector.multi_reduction <maximumf>, %124, %cst_50 [1] : vector<16x16xf32> to vector<16xf32>
    %126 = vector.shape_cast %125 : vector<16xf32> to vector<16x1xf32>
    %127 = vector.broadcast %126 : vector<16x1xf32> to vector<16x16xf32>
    %128 = arith.subf %124, %127 : vector<16x16xf32>
    %129 = math.exp %128 : vector<16x16xf32>
    %cst_51 = arith.constant dense<0.000000e+00> : vector<16xf32>
    %130 = vector.multi_reduction <add>, %129, %cst_51 [1] : vector<16x16xf32> to vector<16xf32>
    %131 = vector.shape_cast %130 : vector<16xf32> to vector<16x1xf32>
    %132 = tpu.reciprocal %131 {approx = true} : vector<16x1xf32> -> vector<16x1xf32>
    %133 = vector.broadcast %132 : vector<16x1xf32> to vector<16x16xf32>
    %134 = arith.mulf %129, %133 : vector<16x16xf32>
    %cst_52 = arith.constant dense<0.000000e+00> : vector<16x8xf32>
    %135 = tpu.matmul %134, %121, %cst_52 {dimension_numbers = #tpu.dot_dimension_numbers<[1], [0], [0], [1], [0, 0, 1, 1], [], []>} : vector<16x16xf32>, vector<16x8xf32>, vector<16x8xf32> -> vector<16x8xf32>
    %136 = vector.extract_strided_slice %32 {offsets = [0, 0], sizes = [8, 32], strides = [1, 1]} : vector<32x32xf32> to vector<8x32xf32>
    %cst_53 = arith.constant dense<0.000000e+00> : vector<16x32xf32>
    %137 = tpu.matmul %135, %136, %cst_53 {dimension_numbers = #tpu.dot_dimension_numbers<[1], [0], [0], [1], [0, 0, 1, 1], [], []>} : vector<16x8xf32>, vector<8x32xf32>, vector<16x32xf32> -> vector<16x32xf32>
    %138 = vector.broadcast %34 : vector<1x32xf32> to vector<16x32xf32>
    %139 = arith.addf %138, %137 : vector<16x32xf32>
    %140 = vector.extract_strided_slice %30 {offsets = [16, 8], sizes = [16, 8], strides = [1, 1]} : vector<32x96xf32> to vector<16x8xf32>
    %141 = vector.extract_strided_slice %30 {offsets = [16, 40], sizes = [16, 8], strides = [1, 1]} : vector<32x96xf32> to vector<16x8xf32>
    %142 = vector.extract_strided_slice %30 {offsets = [16, 72], sizes = [16, 8], strides = [1, 1]} : vector<32x96xf32> to vector<16x8xf32>
    %cst_54 = arith.constant dense<0.000000e+00> : vector<16x16xf32>
    %143 = tpu.matmul %140, %141, %cst_54 {dimension_numbers = #tpu.dot_dimension_numbers<[1], [1], [0], [0], [0, 0, 1, 0], [], []>} : vector<16x8xf32>, vector<16x8xf32>, vector<16x16xf32> -> vector<16x16xf32>
    %cst_55 = arith.constant 0.353553385 : f32
    %144 = vector.broadcast %cst_55 : f32 to vector<16x16xf32>
    %145 = arith.mulf %143, %144 : vector<16x16xf32>
    %cst_56 = arith.constant dense<0xFF800000> : vector<16xf32>
    %146 = vector.multi_reduction <maximumf>, %145, %cst_56 [1] : vector<16x16xf32> to vector<16xf32>
    %147 = vector.shape_cast %146 : vector<16xf32> to vector<16x1xf32>
    %148 = vector.broadcast %147 : vector<16x1xf32> to vector<16x16xf32>
    %149 = arith.subf %145, %148 : vector<16x16xf32>
    %150 = math.exp %149 : vector<16x16xf32>
    %cst_57 = arith.constant dense<0.000000e+00> : vector<16xf32>
    %151 = vector.multi_reduction <add>, %150, %cst_57 [1] : vector<16x16xf32> to vector<16xf32>
    %152 = vector.shape_cast %151 : vector<16xf32> to vector<16x1xf32>
    %153 = tpu.reciprocal %152 {approx = true} : vector<16x1xf32> -> vector<16x1xf32>
    %154 = vector.broadcast %153 : vector<16x1xf32> to vector<16x16xf32>
    %155 = arith.mulf %150, %154 : vector<16x16xf32>
    %cst_58 = arith.constant dense<0.000000e+00> : vector<16x8xf32>
    %156 = tpu.matmul %155, %142, %cst_58 {dimension_numbers = #tpu.dot_dimension_numbers<[1], [0], [0], [1], [0, 0, 1, 1], [], []>} : vector<16x16xf32>, vector<16x8xf32>, vector<16x8xf32> -> vector<16x8xf32>
    %157 = vector.extract_strided_slice %32 {offsets = [8, 0], sizes = [8, 32], strides = [1, 1]} : vector<32x32xf32> to vector<8x32xf32>
    %cst_59 = arith.constant dense<0.000000e+00> : vector<16x32xf32>
    %158 = tpu.matmul %156, %157, %cst_59 {dimension_numbers = #tpu.dot_dimension_numbers<[1], [0], [0], [1], [0, 0, 1, 1], [], []>} : vector<16x8xf32>, vector<8x32xf32>, vector<16x32xf32> -> vector<16x32xf32>
    %159 = arith.addf %139, %158 : vector<16x32xf32>
    %160 = vector.extract_strided_slice %30 {offsets = [16, 16], sizes = [16, 8], strides = [1, 1]} : vector<32x96xf32> to vector<16x8xf32>
    %161 = vector.extract_strided_slice %30 {offsets = [16, 48], sizes = [16, 8], strides = [1, 1]} : vector<32x96xf32> to vector<16x8xf32>
    %162 = vector.extract_strided_slice %30 {offsets = [16, 80], sizes = [16, 8], strides = [1, 1]} : vector<32x96xf32> to vector<16x8xf32>
    %cst_60 = arith.constant dense<0.000000e+00> : vector<16x16xf32>
    %163 = tpu.matmul %160, %161, %cst_60 {dimension_numbers = #tpu.dot_dimension_numbers<[1], [1], [0], [0], [0, 0, 1, 0], [], []>} : vector<16x8xf32>, vector<16x8xf32>, vector<16x16xf32> -> vector<16x16xf32>
    %cst_61 = arith.constant 0.353553385 : f32
    %164 = vector.broadcast %cst_61 : f32 to vector<16x16xf32>
    %165 = arith.mulf %163, %164 : vector<16x16xf32>
    %cst_62 = arith.constant dense<0xFF800000> : vector<16xf32>
    %166 = vector.multi_reduction <maximumf>, %165, %cst_62 [1] : vector<16x16xf32> to vector<16xf32>
    %167 = vector.shape_cast %166 : vector<16xf32> to vector<16x1xf32>
    %168 = vector.broadcast %167 : vector<16x1xf32> to vector<16x16xf32>
    %169 = arith.subf %165, %168 : vector<16x16xf32>
    %170 = math.exp %169 : vector<16x16xf32>
    %cst_63 = arith.constant dense<0.000000e+00> : vector<16xf32>
    %171 = vector.multi_reduction <add>, %170, %cst_63 [1] : vector<16x16xf32> to vector<16xf32>
    %172 = vector.shape_cast %171 : vector<16xf32> to vector<16x1xf32>
    %173 = tpu.reciprocal %172 {approx = true} : vector<16x1xf32> -> vector<16x1xf32>
    %174 = vector.broadcast %173 : vector<16x1xf32> to vector<16x16xf32>
    %175 = arith.mulf %170, %174 : vector<16x16xf32>
    %cst_64 = arith.constant dense<0.000000e+00> : vector<16x8xf32>
    %176 = tpu.matmul %175, %162, %cst_64 {dimension_numbers = #tpu.dot_dimension_numbers<[1], [0], [0], [1], [0, 0, 1, 1], [], []>} : vector<16x16xf32>, vector<16x8xf32>, vector<16x8xf32> -> vector<16x8xf32>
    %177 = vector.extract_strided_slice %32 {offsets = [16, 0], sizes = [8, 32], strides = [1, 1]} : vector<32x32xf32> to vector<8x32xf32>
    %cst_65 = arith.constant dense<0.000000e+00> : vector<16x32xf32>
    %178 = tpu.matmul %176, %177, %cst_65 {dimension_numbers = #tpu.dot_dimension_numbers<[1], [0], [0], [1], [0, 0, 1, 1], [], []>} : vector<16x8xf32>, vector<8x32xf32>, vector<16x32xf32> -> vector<16x32xf32>
    %179 = arith.addf %159, %178 : vector<16x32xf32>
    %180 = vector.extract_strided_slice %30 {offsets = [16, 24], sizes = [16, 8], strides = [1, 1]} : vector<32x96xf32> to vector<16x8xf32>
    %181 = vector.extract_strided_slice %30 {offsets = [16, 56], sizes = [16, 8], strides = [1, 1]} : vector<32x96xf32> to vector<16x8xf32>
    %182 = vector.extract_strided_slice %30 {offsets = [16, 88], sizes = [16, 8], strides = [1, 1]} : vector<32x96xf32> to vector<16x8xf32>
    %cst_66 = arith.constant dense<0.000000e+00> : vector<16x16xf32>
    %183 = tpu.matmul %180, %181, %cst_66 {dimension_numbers = #tpu.dot_dimension_numbers<[1], [1], [0], [0], [0, 0, 1, 0], [], []>} : vector<16x8xf32>, vector<16x8xf32>, vector<16x16xf32> -> vector<16x16xf32>
    %cst_67 = arith.constant 0.353553385 : f32
    %184 = vector.broadcast %cst_67 : f32 to vector<16x16xf32>
    %185 = arith.mulf %183, %184 : vector<16x16xf32>
    %cst_68 = arith.constant dense<0xFF800000> : vector<16xf32>
    %186 = vector.multi_reduction <maximumf>, %185, %cst_68 [1] : vector<16x16xf32> to vector<16xf32>
    %187 = vector.shape_cast %186 : vector<16xf32> to vector<16x1xf32>
    %188 = vector.broadcast %187 : vector<16x1xf32> to vector<16x16xf32>
    %189 = arith.subf %185, %188 : vector<16x16xf32>
    %190 = math.exp %189 : vector<16x16xf32>
    %cst_69 = arith.constant dense<0.000000e+00> : vector<16xf32>
    %191 = vector.multi_reduction <add>, %190, %cst_69 [1] : vector<16x16xf32> to vector<16xf32>
    %192 = vector.shape_cast %191 : vector<16xf32> to vector<16x1xf32>
    %193 = tpu.reciprocal %192 {approx = true} : vector<16x1xf32> -> vector<16x1xf32>
    %194 = vector.broadcast %193 : vector<16x1xf32> to vector<16x16xf32>
    %195 = arith.mulf %190, %194 : vector<16x16xf32>
    %cst_70 = arith.constant dense<0.000000e+00> : vector<16x8xf32>
    %196 = tpu.matmul %195, %182, %cst_70 {dimension_numbers = #tpu.dot_dimension_numbers<[1], [0], [0], [1], [0, 0, 1, 1], [], []>} : vector<16x16xf32>, vector<16x8xf32>, vector<16x8xf32> -> vector<16x8xf32>
    %197 = vector.extract_strided_slice %32 {offsets = [24, 0], sizes = [8, 32], strides = [1, 1]} : vector<32x32xf32> to vector<8x32xf32>
    %cst_71 = arith.constant dense<0.000000e+00> : vector<16x32xf32>
    %198 = tpu.matmul %196, %197, %cst_71 {dimension_numbers = #tpu.dot_dimension_numbers<[1], [0], [0], [1], [0, 0, 1, 1], [], []>} : vector<16x8xf32>, vector<8x32xf32>, vector<16x32xf32> -> vector<16x32xf32>
    %199 = arith.addf %179, %198 : vector<16x32xf32>
    %200 = vector.extract_strided_slice %3 {offsets = [16, 0], sizes = [16, 32], strides = [1, 1]} : vector<32x32xf32> to vector<16x32xf32>
    %201 = arith.addf %200, %199 : vector<16x32xf32>
    %c16 = arith.constant 16 : index
    %c0_72 = arith.constant 0 : index
    %202 = vector.load %arg20[%c16, %c0_72] : memref<32x32xf32, #tpu.memory_space<vmem>>, vector<16x32xf32>
    tpu.vector_store %arg20[%c16, %c0_72], %201 {strides = array<i32>} : memref<32x32xf32, #tpu.memory_space<vmem>>, vector<16x32xf32>,
    %c0_73 = arith.constant 0 : index
    %c0_74 = arith.constant 0 : index
    %203 = vector.load %arg20[%c0_73, %c0_74] : memref<32x32xf32, #tpu.memory_space<vmem>>, vector<32x32xf32>
    %c0_75 = arith.constant 0 : index
    %c0_76 = arith.constant 0 : index
    %c0_77 = arith.constant 0 : index
    %204 = vector.load %arg7[%c0_75, %c0_76, %c0_77] : memref<1x1x32xf32, #tpu.memory_space<vmem>>, vector<1x1x32xf32>
    %205 = vector.shape_cast %204 : vector<1x1x32xf32> to vector<1x32xf32>
    %c0_78 = arith.constant 0 : index
    %c0_79 = arith.constant 0 : index
    %c0_80 = arith.constant 0 : index
    %206 = vector.load %arg8[%c0_78, %c0_79, %c0_80] : memref<1x1x32xf32, #tpu.memory_space<vmem>>, vector<1x1x32xf32>
    %207 = vector.shape_cast %206 : vector<1x1x32xf32> to vector<1x32xf32>
    %cst_81 = arith.constant dense<0.000000e+00> : vector<32xf32>
    %208 = vector.multi_reduction <add>, %203, %cst_81 [1] : vector<32x32xf32> to vector<32xf32>
    %209 = vector.shape_cast %208 : vector<32xf32> to vector<32x1xf32>
    %cst_82 = arith.constant 3.200000e+01 : f32
    %210 = vector.broadcast %cst_82 : f32 to vector<32x1xf32>
    %211 = arith.divf %209, %210 : vector<32x1xf32>
    %212 = vector.broadcast %211 : vector<32x1xf32> to vector<32x32xf32>
    %213 = arith.subf %203, %212 : vector<32x32xf32>
    %214 = arith.mulf %213, %213 : vector<32x32xf32>
    %cst_83 = arith.constant dense<0.000000e+00> : vector<32xf32>
    %215 = vector.multi_reduction <add>, %214, %cst_83 [1] : vector<32x32xf32> to vector<32xf32>
    %216 = vector.shape_cast %215 : vector<32xf32> to vector<32x1xf32>
    %cst_84 = arith.constant 3.200000e+01 : f32
    %217 = vector.broadcast %cst_84 : f32 to vector<32x1xf32>
    %218 = arith.divf %216, %217 : vector<32x1xf32>
    %cst_85 = arith.constant 9.99999974E-6 : f32
    %219 = vector.broadcast %cst_85 : f32 to vector<32x1xf32>
    %220 = arith.addf %218, %219 : vector<32x1xf32>
    %221 = math.rsqrt %220 : vector<32x1xf32>
    %222 = vector.broadcast %221 : vector<32x1xf32> to vector<32x32xf32>
    %223 = arith.mulf %213, %222 : vector<32x32xf32>
    %224 = vector.broadcast %205 : vector<1x32xf32> to vector<32x32xf32>
    %225 = arith.mulf %223, %224 : vector<32x32xf32>
    %226 = vector.broadcast %207 : vector<1x32xf32> to vector<32x32xf32>
    %227 = arith.addf %225, %226 : vector<32x32xf32>
    %c0_86 = arith.constant 0 : index
    %c0_87 = arith.constant 0 : index
    %c0_88 = arith.constant 0 : index
    %228 = vector.load %arg9[%c0_86, %c0_87, %c0_88] : memref<1x32x64xf32, #tpu.memory_space<vmem>>, vector<1x32x64xf32>
    %229 = vector.shape_cast %228 : vector<1x32x64xf32> to vector<32x64xf32>
    %cst_89 = arith.constant dense<0.000000e+00> : vector<32x64xf32>
    %230 = tpu.matmul %227, %229, %cst_89 {dimension_numbers = #tpu.dot_dimension_numbers<[1], [0], [0], [1], [0, 0, 1, 1], [], []>} : vector<32x32xf32>, vector<32x64xf32>, vector<32x64xf32> -> vector<32x64xf32>
    %c0_90 = arith.constant 0 : index
    %c0_91 = arith.constant 0 : index
    %c0_92 = arith.constant 0 : index
    %231 = vector.load %arg10[%c0_90, %c0_91, %c0_92] : memref<1x1x64xf32, #tpu.memory_space<vmem>>, vector<1x1x64xf32>
    %232 = vector.shape_cast %231 : vector<1x1x64xf32> to vector<1x64xf32>
    %233 = vector.broadcast %232 : vector<1x64xf32> to vector<32x64xf32>
    %234 = arith.addf %230, %233 : vector<32x64xf32>
    %cst_93 = arith.constant 5.000000e-01 : f32
    %235 = vector.broadcast %cst_93 : f32 to vector<32x64xf32>
    %236 = arith.mulf %235, %234 : vector<32x64xf32>
    %cst_94 = arith.constant 0.707106769 : f32
    %237 = vector.broadcast %cst_94 : f32 to vector<32x64xf32>
    %238 = arith.mulf %234, %237 : vector<32x64xf32>
    %239 = math.erf %238 : vector<32x64xf32>
    %cst_95 = arith.constant 1.000000e+00 : f32
    %240 = vector.broadcast %cst_95 : f32 to vector<32x64xf32>
    %241 = arith.addf %240, %239 : vector<32x64xf32>
    %242 = arith.mulf %236, %241 : vector<32x64xf32>
    %c0_96 = arith.constant 0 : index
    %c0_97 = arith.constant 0 : index
    %c0_98 = arith.constant 0 : index
    %243 = vector.load %arg11[%c0_96, %c0_97, %c0_98] : memref<1x64x32xf32, #tpu.memory_space<vmem>>, vector<1x64x32xf32>
    %244 = vector.shape_cast %243 : vector<1x64x32xf32> to vector<64x32xf32>
    %cst_99 = arith.constant dense<0.000000e+00> : vector<32x32xf32>
    %245 = tpu.matmul %242, %244, %cst_99 {dimension_numbers = #tpu.dot_dimension_numbers<[1], [0], [0], [1], [0, 0, 1, 1], [], []>} : vector<32x64xf32>, vector<64x32xf32>, vector<32x32xf32> -> vector<32x32xf32>
    %c0_100 = arith.constant 0 : index
    %c0_101 = arith.constant 0 : index
    %c0_102 = arith.constant 0 : index
    %246 = vector.load %arg12[%c0_100, %c0_101, %c0_102] : memref<1x1x32xf32, #tpu.memory_space<vmem>>, vector<1x1x32xf32>
    %247 = vector.shape_cast %246 : vector<1x1x32xf32> to vector<1x32xf32>
    %248 = vector.broadcast %247 : vector<1x32xf32> to vector<32x32xf32>
    %249 = arith.addf %245, %248 : vector<32x32xf32>
    %250 = arith.addf %203, %249 : vector<32x32xf32>
    %c0_103 = arith.constant 0 : index
    %c0_104 = arith.constant 0 : index
    %251 = vector.load %arg20[%c0_103, %c0_104] : memref<32x32xf32, #tpu.memory_space<vmem>>, vector<32x32xf32>
    tpu.vector_store %arg20[%c0_103, %c0_104], %250 {strides = array<i32>} : memref<32x32xf32, #tpu.memory_space<vmem>>, vector<32x32xf32>,
    %c1_i32 = arith.constant 1 : i32
    %252 = arith.cmpi eq, %arg0, %c1_i32 : i32
    %253 = arith.extui %252 : i1 to i32
    %c0_i32_105 = arith.constant 0 : i32
    %254 = arith.cmpi ne, %253, %c0_i32_105 : i32
    scf.if %254 {
      %255 = vector.extract_strided_slice %250 {offsets = [0, 0], sizes = [4, 32], strides = [1, 1]} : vector<32x32xf32> to vector<4x32xf32>
      %c0_106 = arith.constant 0 : index
      %c0_107 = arith.constant 0 : index
      %256 = vector.load %arg14[%c0_106, %c0_107] : memref<1x32xf32, #tpu.memory_space<vmem>>, vector<1x32xf32>
      %257 = vector.extract_strided_slice %255 {offsets = [0, 0], sizes = [1, 32], strides = [1, 1]} : vector<4x32xf32> to vector<1x32xf32>
      %c0_108 = arith.constant 0 : index
      %c0_109 = arith.constant 0 : index
      %c0_110 = arith.constant 0 : index
      %258 = vector.load %arg13[%c0_108, %c0_109, %c0_110] : memref<4x32x32xf32, #tpu.memory_space<vmem>>, vector<1x32x32xf32>
      %259 = vector.shape_cast %258 : vector<1x32x32xf32> to vector<32x32xf32>
      %cst_111 = arith.constant dense<0.000000e+00> : vector<1x32xf32>
      %260 = tpu.matmul %257, %259, %cst_111 {dimension_numbers = #tpu.dot_dimension_numbers<[1], [0], [0], [1], [0, 0, 1, 1], [], []>} : vector<1x32xf32>, vector<32x32xf32>, vector<1x32xf32> -> vector<1x32xf32>
      %261 = arith.addf %256, %260 : vector<1x32xf32>
      %262 = vector.extract_strided_slice %255 {offsets = [1, 0], sizes = [1, 32], strides = [1, 1]} : vector<4x32xf32> to vector<1x32xf32>
      %c1 = arith.constant 1 : index
      %c0_112 = arith.constant 0 : index
      %c0_113 = arith.constant 0 : index
      %263 = vector.load %arg13[%c1, %c0_112, %c0_113] : memref<4x32x32xf32, #tpu.memory_space<vmem>>, vector<1x32x32xf32>
      %264 = vector.shape_cast %263 : vector<1x32x32xf32> to vector<32x32xf32>
      %cst_114 = arith.constant dense<0.000000e+00> : vector<1x32xf32>
      %265 = tpu.matmul %262, %264, %cst_114 {dimension_numbers = #tpu.dot_dimension_numbers<[1], [0], [0], [1], [0, 0, 1, 1], [], []>} : vector<1x32xf32>, vector<32x32xf32>, vector<1x32xf32> -> vector<1x32xf32>
      %266 = arith.addf %261, %265 : vector<1x32xf32>
      %267 = vector.extract_strided_slice %255 {offsets = [2, 0], sizes = [1, 32], strides = [1, 1]} : vector<4x32xf32> to vector<1x32xf32>
      %c2 = arith.constant 2 : index
      %c0_115 = arith.constant 0 : index
      %c0_116 = arith.constant 0 : index
      %268 = vector.load %arg13[%c2, %c0_115, %c0_116] : memref<4x32x32xf32, #tpu.memory_space<vmem>>, vector<1x32x32xf32>
      %269 = vector.shape_cast %268 : vector<1x32x32xf32> to vector<32x32xf32>
      %cst_117 = arith.constant dense<0.000000e+00> : vector<1x32xf32>
      %270 = tpu.matmul %267, %269, %cst_117 {dimension_numbers = #tpu.dot_dimension_numbers<[1], [0], [0], [1], [0, 0, 1, 1], [], []>} : vector<1x32xf32>, vector<32x32xf32>, vector<1x32xf32> -> vector<1x32xf32>
      %271 = arith.addf %266, %270 : vector<1x32xf32>
      %272 = vector.extract_strided_slice %255 {offsets = [3, 0], sizes = [1, 32], strides = [1, 1]} : vector<4x32xf32> to vector<1x32xf32>
      %c3 = arith.constant 3 : index
      %c0_118 = arith.constant 0 : index
      %c0_119 = arith.constant 0 : index
      %273 = vector.load %arg13[%c3, %c0_118, %c0_119] : memref<4x32x32xf32, #tpu.memory_space<vmem>>, vector<1x32x32xf32>
      %274 = vector.shape_cast %273 : vector<1x32x32xf32> to vector<32x32xf32>
      %cst_120 = arith.constant dense<0.000000e+00> : vector<1x32xf32>
      %275 = tpu.matmul %272, %274, %cst_120 {dimension_numbers = #tpu.dot_dimension_numbers<[1], [0], [0], [1], [0, 0, 1, 1], [], []>} : vector<1x32xf32>, vector<32x32xf32>, vector<1x32xf32> -> vector<1x32xf32>
      %276 = arith.addf %271, %275 : vector<1x32xf32>
      %cst_121 = arith.constant 0.000000e+00 : f32
      %277 = vector.broadcast %cst_121 : f32 to vector<1x32xf32>
      %278 = arith.maximumf %276, %277 : vector<1x32xf32>
      %c0_122 = arith.constant 0 : index
      %c0_123 = arith.constant 0 : index
      %279 = vector.load %arg15[%c0_122, %c0_123] : memref<1x32xf32, #tpu.memory_space<vmem>>, vector<1x32xf32>
      %c0_124 = arith.constant 0 : index
      %c0_125 = arith.constant 0 : index
      %280 = vector.load %arg16[%c0_124, %c0_125] : memref<1x32xf32, #tpu.memory_space<vmem>>, vector<1x32xf32>
      %cst_126 = arith.constant dense<0.000000e+00> : vector<1xf32>
      %281 = vector.multi_reduction <add>, %278, %cst_126 [1] : vector<1x32xf32> to vector<1xf32>
      %282 = vector.shape_cast %281 : vector<1xf32> to vector<1x1xf32>
      %cst_127 = arith.constant 3.200000e+01 : f32
      %283 = vector.broadcast %cst_127 : f32 to vector<1x1xf32>
      %284 = arith.divf %282, %283 : vector<1x1xf32>
      %285 = vector.broadcast %284 : vector<1x1xf32> to vector<1x32xf32>
      %286 = arith.subf %278, %285 : vector<1x32xf32>
      %287 = arith.mulf %286, %286 : vector<1x32xf32>
      %cst_128 = arith.constant dense<0.000000e+00> : vector<1xf32>
      %288 = vector.multi_reduction <add>, %287, %cst_128 [1] : vector<1x32xf32> to vector<1xf32>
      %289 = vector.shape_cast %288 : vector<1xf32> to vector<1x1xf32>
      %cst_129 = arith.constant 3.200000e+01 : f32
      %290 = vector.broadcast %cst_129 : f32 to vector<1x1xf32>
      %291 = arith.divf %289, %290 : vector<1x1xf32>
      %cst_130 = arith.constant 9.99999974E-6 : f32
      %292 = vector.broadcast %cst_130 : f32 to vector<1x1xf32>
      %293 = arith.addf %291, %292 : vector<1x1xf32>
      %294 = math.rsqrt %293 : vector<1x1xf32>
      %295 = vector.broadcast %294 : vector<1x1xf32> to vector<1x32xf32>
      %296 = arith.mulf %286, %295 : vector<1x32xf32>
      %297 = arith.mulf %296, %279 : vector<1x32xf32>
      %298 = arith.addf %297, %280 : vector<1x32xf32>
      %c0_131 = arith.constant 0 : index
      %c0_132 = arith.constant 0 : index
      %299 = vector.load %arg17[%c0_131, %c0_132] : memref<32x4xf32, #tpu.memory_space<vmem>>, vector<32x4xf32>
      %cst_133 = arith.constant dense<0.000000e+00> : vector<1x4xf32>
      %300 = tpu.matmul %298, %299, %cst_133 {dimension_numbers = #tpu.dot_dimension_numbers<[1], [0], [0], [1], [0, 0, 1, 1], [], []>} : vector<1x32xf32>, vector<32x4xf32>, vector<1x4xf32> -> vector<1x4xf32>
      %c0_134 = arith.constant 0 : index
      %c0_135 = arith.constant 0 : index
      %301 = vector.load %arg18[%c0_134, %c0_135] : memref<1x4xf32, #tpu.memory_space<vmem>>, vector<1x4xf32>
      %302 = arith.addf %300, %301 : vector<1x4xf32>
      %c0_136 = arith.constant 0 : index
      %c0_137 = arith.constant 0 : index
      %303 = vector.load %arg19[%c0_136, %c0_137] : memref<2x4xf32, #tpu.memory_space<vmem>>, vector<1x4xf32>
      tpu.vector_store %arg19[%c0_136, %c0_137], %302 {strides = array<i32>} : memref<2x4xf32, #tpu.memory_space<vmem>>, vector<1x4xf32>,
      %304 = vector.extract_strided_slice %250 {offsets = [16, 0], sizes = [4, 32], strides = [1, 1]} : vector<32x32xf32> to vector<4x32xf32>
      %c0_138 = arith.constant 0 : index
      %c0_139 = arith.constant 0 : index
      %305 = vector.load %arg14[%c0_138, %c0_139] : memref<1x32xf32, #tpu.memory_space<vmem>>, vector<1x32xf32>
      %306 = vector.extract_strided_slice %304 {offsets = [0, 0], sizes = [1, 32], strides = [1, 1]} : vector<4x32xf32> to vector<1x32xf32>
      %c0_140 = arith.constant 0 : index
      %c0_141 = arith.constant 0 : index
      %c0_142 = arith.constant 0 : index
      %307 = vector.load %arg13[%c0_140, %c0_141, %c0_142] : memref<4x32x32xf32, #tpu.memory_space<vmem>>, vector<1x32x32xf32>
      %308 = vector.shape_cast %307 : vector<1x32x32xf32> to vector<32x32xf32>
      %cst_143 = arith.constant dense<0.000000e+00> : vector<1x32xf32>
      %309 = tpu.matmul %306, %308, %cst_143 {dimension_numbers = #tpu.dot_dimension_numbers<[1], [0], [0], [1], [0, 0, 1, 1], [], []>} : vector<1x32xf32>, vector<32x32xf32>, vector<1x32xf32> -> vector<1x32xf32>
      %310 = arith.addf %305, %309 : vector<1x32xf32>
      %311 = vector.extract_strided_slice %304 {offsets = [1, 0], sizes = [1, 32], strides = [1, 1]} : vector<4x32xf32> to vector<1x32xf32>
      %c1_144 = arith.constant 1 : index
      %c0_145 = arith.constant 0 : index
      %c0_146 = arith.constant 0 : index
      %312 = vector.load %arg13[%c1_144, %c0_145, %c0_146] : memref<4x32x32xf32, #tpu.memory_space<vmem>>, vector<1x32x32xf32>
      %313 = vector.shape_cast %312 : vector<1x32x32xf32> to vector<32x32xf32>
      %cst_147 = arith.constant dense<0.000000e+00> : vector<1x32xf32>
      %314 = tpu.matmul %311, %313, %cst_147 {dimension_numbers = #tpu.dot_dimension_numbers<[1], [0], [0], [1], [0, 0, 1, 1], [], []>} : vector<1x32xf32>, vector<32x32xf32>, vector<1x32xf32> -> vector<1x32xf32>
      %315 = arith.addf %310, %314 : vector<1x32xf32>
      %316 = vector.extract_strided_slice %304 {offsets = [2, 0], sizes = [1, 32], strides = [1, 1]} : vector<4x32xf32> to vector<1x32xf32>
      %c2_148 = arith.constant 2 : index
      %c0_149 = arith.constant 0 : index
      %c0_150 = arith.constant 0 : index
      %317 = vector.load %arg13[%c2_148, %c0_149, %c0_150] : memref<4x32x32xf32, #tpu.memory_space<vmem>>, vector<1x32x32xf32>
      %318 = vector.shape_cast %317 : vector<1x32x32xf32> to vector<32x32xf32>
      %cst_151 = arith.constant dense<0.000000e+00> : vector<1x32xf32>
      %319 = tpu.matmul %316, %318, %cst_151 {dimension_numbers = #tpu.dot_dimension_numbers<[1], [0], [0], [1], [0, 0, 1, 1], [], []>} : vector<1x32xf32>, vector<32x32xf32>, vector<1x32xf32> -> vector<1x32xf32>
      %320 = arith.addf %315, %319 : vector<1x32xf32>
      %321 = vector.extract_strided_slice %304 {offsets = [3, 0], sizes = [1, 32], strides = [1, 1]} : vector<4x32xf32> to vector<1x32xf32>
      %c3_152 = arith.constant 3 : index
      %c0_153 = arith.constant 0 : index
      %c0_154 = arith.constant 0 : index
      %322 = vector.load %arg13[%c3_152, %c0_153, %c0_154] : memref<4x32x32xf32, #tpu.memory_space<vmem>>, vector<1x32x32xf32>
      %323 = vector.shape_cast %322 : vector<1x32x32xf32> to vector<32x32xf32>
      %cst_155 = arith.constant dense<0.000000e+00> : vector<1x32xf32>
      %324 = tpu.matmul %321, %323, %cst_155 {dimension_numbers = #tpu.dot_dimension_numbers<[1], [0], [0], [1], [0, 0, 1, 1], [], []>} : vector<1x32xf32>, vector<32x32xf32>, vector<1x32xf32> -> vector<1x32xf32>
      %325 = arith.addf %320, %324 : vector<1x32xf32>
      %cst_156 = arith.constant 0.000000e+00 : f32
      %326 = vector.broadcast %cst_156 : f32 to vector<1x32xf32>
      %327 = arith.maximumf %325, %326 : vector<1x32xf32>
      %c0_157 = arith.constant 0 : index
      %c0_158 = arith.constant 0 : index
      %328 = vector.load %arg15[%c0_157, %c0_158] : memref<1x32xf32, #tpu.memory_space<vmem>>, vector<1x32xf32>
      %c0_159 = arith.constant 0 : index
      %c0_160 = arith.constant 0 : index
      %329 = vector.load %arg16[%c0_159, %c0_160] : memref<1x32xf32, #tpu.memory_space<vmem>>, vector<1x32xf32>
      %cst_161 = arith.constant dense<0.000000e+00> : vector<1xf32>
      %330 = vector.multi_reduction <add>, %327, %cst_161 [1] : vector<1x32xf32> to vector<1xf32>
      %331 = vector.shape_cast %330 : vector<1xf32> to vector<1x1xf32>
      %cst_162 = arith.constant 3.200000e+01 : f32
      %332 = vector.broadcast %cst_162 : f32 to vector<1x1xf32>
      %333 = arith.divf %331, %332 : vector<1x1xf32>
      %334 = vector.broadcast %333 : vector<1x1xf32> to vector<1x32xf32>
      %335 = arith.subf %327, %334 : vector<1x32xf32>
      %336 = arith.mulf %335, %335 : vector<1x32xf32>
      %cst_163 = arith.constant dense<0.000000e+00> : vector<1xf32>
      %337 = vector.multi_reduction <add>, %336, %cst_163 [1] : vector<1x32xf32> to vector<1xf32>
      %338 = vector.shape_cast %337 : vector<1xf32> to vector<1x1xf32>
      %cst_164 = arith.constant 3.200000e+01 : f32
      %339 = vector.broadcast %cst_164 : f32 to vector<1x1xf32>
      %340 = arith.divf %338, %339 : vector<1x1xf32>
      %cst_165 = arith.constant 9.99999974E-6 : f32
      %341 = vector.broadcast %cst_165 : f32 to vector<1x1xf32>
      %342 = arith.addf %340, %341 : vector<1x1xf32>
      %343 = math.rsqrt %342 : vector<1x1xf32>
      %344 = vector.broadcast %343 : vector<1x1xf32> to vector<1x32xf32>
      %345 = arith.mulf %335, %344 : vector<1x32xf32>
      %346 = arith.mulf %345, %328 : vector<1x32xf32>
      %347 = arith.addf %346, %329 : vector<1x32xf32>
      %c0_166 = arith.constant 0 : index
      %c0_167 = arith.constant 0 : index
      %348 = vector.load %arg17[%c0_166, %c0_167] : memref<32x4xf32, #tpu.memory_space<vmem>>, vector<32x4xf32>
      %cst_168 = arith.constant dense<0.000000e+00> : vector<1x4xf32>
      %349 = tpu.matmul %347, %348, %cst_168 {dimension_numbers = #tpu.dot_dimension_numbers<[1], [0], [0], [1], [0, 0, 1, 1], [], []>} : vector<1x32xf32>, vector<32x4xf32>, vector<1x4xf32> -> vector<1x4xf32>
      %c0_169 = arith.constant 0 : index
      %c0_170 = arith.constant 0 : index
      %350 = vector.load %arg18[%c0_169, %c0_170] : memref<1x4xf32, #tpu.memory_space<vmem>>, vector<1x4xf32>
      %351 = arith.addf %349, %350 : vector<1x4xf32>
      %c1_171 = arith.constant 1 : index
      %c0_172 = arith.constant 0 : index
      %352 = vector.load %arg19[%c1_171, %c0_172] : memref<2x4xf32, #tpu.memory_space<vmem>>, vector<1x4xf32>
      tpu.vector_store %arg19[%c1_171, %c0_172], %351 {strides = array<i32>} : memref<2x4xf32, #tpu.memory_space<vmem>>, vector<1x4xf32>,
    } else {
    }
    return
  }
  func.func @transform_0(%arg0: i32) -> (i32, i32) {
    %c0_i32 = arith.constant 0 : i32
    %c0_i32_0 = arith.constant 0 : i32
    %c0_i32_1 = arith.constant 0 : i32
    return %c0_i32, %c0_i32_0 : i32, i32
  }
  func.func @transform_1(%arg0: i32) -> (i32, i32, i32) {
    %c0_i32 = arith.constant 0 : i32
    %c0_i32_0 = arith.constant 0 : i32
    %c0_i32_1 = arith.constant 0 : i32
    return %arg0, %c0_i32, %c0_i32_0 : i32, i32, i32
  }
  func.func @transform_2(%arg0: i32) -> (i32, i32, i32) {
    %c0_i32 = arith.constant 0 : i32
    %c0_i32_0 = arith.constant 0 : i32
    %c0_i32_1 = arith.constant 0 : i32
    return %arg0, %c0_i32, %c0_i32_0 : i32, i32, i32
  }
  func.func @transform_3(%arg0: i32) -> (i32, i32, i32) {
    %c0_i32 = arith.constant 0 : i32
    %c0_i32_0 = arith.constant 0 : i32
    %c0_i32_1 = arith.constant 0 : i32
    return %arg0, %c0_i32, %c0_i32_0 : i32, i32, i32
  }
  func.func @transform_4(%arg0: i32) -> (i32, i32, i32) {
    %c0_i32 = arith.constant 0 : i32
    %c0_i32_0 = arith.constant 0 : i32
    %c0_i32_1 = arith.constant 0 : i32
    return %arg0, %c0_i32, %c0_i32_0 : i32, i32, i32
  }
  func.func @transform_5(%arg0: i32) -> (i32, i32, i32) {
    %c0_i32 = arith.constant 0 : i32
    %c0_i32_0 = arith.constant 0 : i32
    %c0_i32_1 = arith.constant 0 : i32
    return %arg0, %c0_i32, %c0_i32_0 : i32, i32, i32
  }
  func.func @transform_6(%arg0: i32) -> (i32, i32, i32) {
    %c0_i32 = arith.constant 0 : i32
    %c0_i32_0 = arith.constant 0 : i32
    %c0_i32_1 = arith.constant 0 : i32
    return %arg0, %c0_i32, %c0_i32_0 : i32, i32, i32
  }
  func.func @transform_7(%arg0: i32) -> (i32, i32, i32) {
    %c0_i32 = arith.constant 0 : i32
    %c0_i32_0 = arith.constant 0 : i32
    %c0_i32_1 = arith.constant 0 : i32
    return %arg0, %c0_i32, %c0_i32_0 : i32, i32, i32
  }
  func.func @transform_8(%arg0: i32) -> (i32, i32, i32) {
    %c0_i32 = arith.constant 0 : i32
    %c0_i32_0 = arith.constant 0 : i32
    %c0_i32_1 = arith.constant 0 : i32
    return %arg0, %c0_i32, %c0_i32_0 : i32, i32, i32
  }
  func.func @transform_9(%arg0: i32) -> (i32, i32, i32) {
    %c0_i32 = arith.constant 0 : i32
    %c0_i32_0 = arith.constant 0 : i32
    %c0_i32_1 = arith.constant 0 : i32
    return %arg0, %c0_i32, %c0_i32_0 : i32, i32, i32
  }
  func.func @transform_10(%arg0: i32) -> (i32, i32, i32) {
    %c0_i32 = arith.constant 0 : i32
    %c0_i32_0 = arith.constant 0 : i32
    %c0_i32_1 = arith.constant 0 : i32
    return %arg0, %c0_i32, %c0_i32_0 : i32, i32, i32
  }
  func.func @transform_11(%arg0: i32) -> (i32, i32, i32) {
    %c0_i32 = arith.constant 0 : i32
    %c0_i32_0 = arith.constant 0 : i32
    %c0_i32_1 = arith.constant 0 : i32
    return %arg0, %c0_i32, %c0_i32_0 : i32, i32, i32
  }
  func.func @transform_12(%arg0: i32) -> (i32, i32, i32) {
    %c0_i32 = arith.constant 0 : i32
    %c0_i32_0 = arith.constant 0 : i32
    %c0_i32_1 = arith.constant 0 : i32
    %c0_i32_2 = arith.constant 0 : i32
    return %c0_i32, %c0_i32_0, %c0_i32_1 : i32, i32, i32
  }
  func.func @transform_13(%arg0: i32) -> (i32, i32) {
    %c0_i32 = arith.constant 0 : i32
    %c0_i32_0 = arith.constant 0 : i32
    %c0_i32_1 = arith.constant 0 : i32
    return %c0_i32, %c0_i32_0 : i32, i32
  }
  func.func @transform_14(%arg0: i32) -> (i32, i32) {
    %c0_i32 = arith.constant 0 : i32
    %c0_i32_0 = arith.constant 0 : i32
    %c0_i32_1 = arith.constant 0 : i32
    return %c0_i32, %c0_i32_0 : i32, i32
  }
  func.func @transform_15(%arg0: i32) -> (i32, i32) {
    %c0_i32 = arith.constant 0 : i32
    %c0_i32_0 = arith.constant 0 : i32
    %c0_i32_1 = arith.constant 0 : i32
    return %c0_i32, %c0_i32_0 : i32, i32
  }
  func.func @transform_16(%arg0: i32) -> (i32, i32) {
    %c0_i32 = arith.constant 0 : i32
    %c0_i32_0 = arith.constant 0 : i32
    %c0_i32_1 = arith.constant 0 : i32
    return %c0_i32, %c0_i32_0 : i32, i32
  }
  func.func @transform_17(%arg0: i32) -> (i32, i32) {
    %c0_i32 = arith.constant 0 : i32
    %c0_i32_0 = arith.constant 0 : i32
    %c0_i32_1 = arith.constant 0 : i32
    return %c0_i32, %c0_i32_0 : i32, i32
  }
  func.func @transform_18(%arg0: i32) -> (i32, i32) {
    %c0_i32 = arith.constant 0 : i32
    %c0_i32_0 = arith.constant 0 : i32
    %c0_i32_1 = arith.constant 0 : i32
    return %c0_i32, %c0_i32_0 : i32, i32
  }
}

</mosaic_0001>

<bundles_post_ra>
// kernel: base_transformer_forward.1
= control target key start
LH: loop header
LB: loop body
LE: loop exit
PB: predicated region body
PF: predicated region fallthrough
CT: control target
= control target key end

     0   :  { %s7067_s0 = inlined_call_operand.vmem [shape: f32[32,32], index: 0, kind: input, shape index: {}]   ;;  %s7068_s1 = inlined_call_operand.vmem [shape: f32[2,1,32], index: 1, kind: input, shape index: {}]   ;;  %s7069_s2 = inlined_call_operand.vmem [shape: f32[2,1,32], index: 2, kind: input, shape index: {}]   ;;  %s7070_s3 = inlined_call_operand.vmem [shape: f32[2,32,96], index: 3, kind: input, shape index: {}]   ;;  %s7071_s4 = inlined_call_operand.vmem [shape: f32[2,32,32], index: 4, kind: input, shape index: {}]   ;;  %s7072_s5 = inlined_call_operand.hbm [shape: f32[2,1,32], index: 5, kind: input, shape index: {}]   ;;  %s7073_s6 = inlined_call_operand.vmem [shape: f32[2,1,32], index: 6, kind: input, shape index: {}]   ;;  %s7074_s7 = inlined_call_operand.vmem [shape: f32[2,1,32], index: 7, kind: input, shape index: {}]   ;;  %s7075_s8 = inlined_call_operand.vmem [shape: f32[2,32,64], index: 8, kind: input, shape index: {}]   ;;  %s7076_s9 = inlined_call_operand.hbm [shape: f32[2,1,64], index: 9, kind: input, shape index: {}]   ;;  %s7077_s10 = inlined_call_operand.vmem [shape: f32[2,64,32], index: 10, kind: input, shape index: {}]   ;;  %s7078_s11 = inlined_call_operand.hbm [shape: f32[2,1,32], index: 11, kind: input, shape index: {}]   ;;  %s7079_s12 = inlined_call_operand.vmem [shape: f32[4,32,32], index: 12, kind: input, shape index: {}]   ;;  %s7080_s13 = inlined_call_operand.hbm [shape: f32[1,32], index: 13, kind: input, shape index: {}]   ;;  %s7081_s14 = inlined_call_operand.hbm [shape: f32[1,32], index: 14, kind: input, shape index: {}]   ;;  %s7082_s15 = inlined_call_operand.hbm [shape: f32[1,32], index: 15, kind: input, shape index: {}]   ;;  %s7083_s16 = inlined_call_operand.vmem [shape: f32[32,4], index: 16, kind: input, shape index: {}]   ;;  %s7084_s17 = inlined_call_operand.hbm [shape: f32[1,4], index: 17, kind: input, shape index: {}]   ;;  %s7085_s18 = inlined_call_operand.hbm [shape: f32[2,4], index: 18, kind: output, shape index: {}]  }
   0x1   :  { %7104 = sst [smem:[#allocation24_spill]] %s7067_s0 }
   0x2   :  { %7105 = sst [smem:[#allocation25_spill]] %s7068_s1 }
   0x3   :  { %7106 = sst [smem:[#allocation26_spill]] %s7069_s2 }
   0x4   :  { %7107 = sst [smem:[#allocation27_spill]] %s7075_s8 }
   0x5   :  { %7108 = sst [smem:[#allocation28_spill]] %s7076_s9 }
   0x6   :  { %7109 = sst [smem:[#allocation29_spill]] %s7077_s10 }
   0x7   :  { %7110 = sst [smem:[#allocation30_spill]] %s7079_s12 }
   0x8   :  { %7111 = sst [smem:[#allocation31_spill]] %s7080_s13 }
   0x9   :  { %7112 = sst [smem:[#allocation32_spill]] %s7082_s15 }
   0xa   :  { %7113 = sst [smem:[#allocation33_spill]] %s7083_s16 }
   0xb   :  { %7114 = sst [smem:[#allocation34_spill]] %s7085_s18 }
   0xc   :  { %23 = vsyncpa [#allocation4], 0 }
   0xd   :  { %25 = vsyncpa [#allocation4 + $0x1], 0 }
   0xe   :  { %26 = vsyncpa [#allocation7], 0 }
   0xf   :  { %28 = vsyncpa [#allocation7 + $0x1], 0 }
  0x10   :  { %29 = vsyncpa [#allocation10], 0 }
  0x11   :  { %30 = vsyncpa [#allocation13], 0 }
  0x12   :  { %31 = vsyncpa [#allocation5], 0  ;;  %s6199_s27 = smov 0   ;;  %s6201_s28 = smov 0  }
  0x13   :  { %s6203_s29 = smov 0   ;;  %s6205_s30 = smov 0  }
  0x14 LB: > { %7115 = sst [smem:[#allocation21_spill]] %s6076_s29  ;;  %s6082_s0 = smov [#allocation9]   ;;  %s6080_s30 = sphi %s6205_s30, %s7159_s30   ;;  %s6076_s29 = sphi %s6203_s29, %s7161_s29   ;;  %s6072_s28 = sphi %s6201_s28, %s7163_s28   ;;  %s6068_s27 = sphi %s6199_s27, %s7162_s27  }
  0x15   : > { %s515_s19 = sshll.u32 %s6082_s0, 4  ;;  %s6220_s1 = sadd.s32 4294967295, %s6080_s30   ;;  %s516_s19 = int_to_ptr.vmem [resolvable:$true] %s515_s19 }
  0x16   : > { %p4688_p0 = scmp.ge.s32.totalorder %s6080_s30, 1  ;;  %p7089_p1 = scmp.eq.s32.totalorder %s6220_s1, 0 }
  0x17   : > { %p496_p2 = scmp.lt.s32.totalorder %s6080_s30, 3  ;;  %s6083_s21 = smov [#allocation12]  }
  0x18   : > { %s537_s22 = sshll.u32 %s6083_s21, 4  ;;  %s7118_s13 = sld [smem:[#allocation31_spill]]  ;;  %s6232_s22 = int_to_ptr.vmem [resolvable:$true] %s537_s22 }
  0x19   : > { %p6226_p4 = pnand %p4688_p0, %p496_p2 }
  0x1b   : > { %s7116_s20 = scalar_select %p6226_p4, 1, 0 }
  0x1c   : > { %p5543_p5 = pneg %p6226_p4 }
  0x1e   : > { %p6236_p6 = pnand %p5543_p5, %p7089_p1  ;;  %s5802_s25 = scalar_lea.hbm %s7118_s13, 16 }
  0x1f   : > { %p5803_p7 = scmp.ne.s32.totalorder %s7118_s13, %s5802_s25  ;;  %p5809_p11 = scmp.lt.u32.totalorder %s5802_s25, %s7118_s13 }
  0x20   : > { %s7117_s2 = scalar_select %p6236_p6, 1, 0 }
  0x21   : > { %p6248_p8 = pneg %p6236_p6 }
  0x23   : > { %s7119_s18 = scalar_select %p6248_p8, 1, 0 }
  0x24   : > { %p5805_p9 = pnand %p6248_p8, %p5803_p7 }
  0x26   : > { %p5806_p10 = pneg %p5805_p9 }
  0x28   : > { %p5811_p12 = pnand %p5809_p11, %p5806_p10 }
  0x2a   : > { %5814 = shalt.err (!%p5811_p12)
}
  0x2b   : > { %s5815_s23 = scalar_lea.vmem %s516_s19, 16  ;;  %s5822_s24 = scalar_lea.vmem %s516_s19, 32 }
  0x2c   : > { %p5816_p13 = scmp.ne.s32.totalorder %s516_s19, %s5815_s23  ;;  %p5823_p5 = scmp.lt.s32.totalorder %s516_s19, %s516_s19 }
  0x2d   : > { %p5824_p3 = scmp.lt.s32.totalorder %s5822_s24, %s5815_s23 }
  0x2e   : > { %p5818_p0 = pnand %p5816_p13, %p6248_p8 }
  0x2f   : > { %p5825_p1 = por %p5824_p3, %p5823_p5 }
  0x30   : > { %p5819_p2 = pneg %p5818_p0 }
  0x32   : > { %p5826_p4 = pnand %p5825_p1, %p5819_p2 }
  0x34   : > { %5829 = shalt.err (!%p5826_p4)
}
  0x35   : > { %5546 = dma.hbm_to_vmem [thread:$0]  (!%p6236_p6), %s7118_s13, 16, %s516_s19, [#allocation10]  }
  0x36   : > { %s7120_s15 = sld [smem:[#allocation32_spill]] }
  0x3c   : > { %s5830_s21 = scalar_lea.hbm %s7120_s15, 16 }
  0x3d   : > { %p5831_p7 = scmp.ne.s32.totalorder %s7120_s15, %s5830_s21  ;;  %p5837_p1 = scmp.lt.u32.totalorder %s5830_s21, %s7120_s15 }
  0x3f   : > { %p5833_p9 = pnand %p5831_p7, %p6248_p8 }
  0x41   : > { %p5834_p3 = pneg %p5833_p9 }
  0x43   : > { %p5839_p4 = pnand %p5837_p1, %p5834_p3 }
  0x45   : > { %5842 = shalt.err (!%p5839_p4)
}
  0x46   : > { %s5843_s19 = scalar_lea.vmem %s6232_s22, 16  ;;  %s5850_s10 = scalar_lea.vmem %s6232_s22, 32 }
  0x47   : > { %p5844_p10 = scmp.ne.s32.totalorder %s6232_s22, %s5843_s19  ;;  %p5851_p13 = scmp.lt.s32.totalorder %s6232_s22, %s6232_s22 }
  0x48   : > { %p5852_p0 = scmp.lt.s32.totalorder %s5850_s10, %s5843_s19 }
  0x49   : > { %p5846_p11 = pnand %p5844_p10, %p6248_p8 }
  0x4a   : > { %p5853_p2 = por %p5852_p0, %p5851_p13 }
  0x4b   : > { %p5847_p12 = pneg %p5846_p11 }
  0x4d   : > { %p5854_p5 = pnand %p5853_p2, %p5847_p12 }
  0x4f   : > { %5857 = shalt.err (!%p5854_p5)
}
  0x50   : > { %5552 = dma.hbm_to_vmem [thread:$0]  (!%p6236_p6), %s7120_s15, 16, %s6232_s22, [#allocation13]  }
  0x51   : > { %s6289_s0 = sadd.s32 1, %s6080_s30   ;;  %s169_s16 = sadd.s32 1, %s6076_s29 }
  0x52   : > { %7121 = sst [smem:[#allocation22_spill]] %s6289_s0  ;;  %s166_s25 = ssub.s32 %s6080_s30, %s6289_s0 }
  0x53   : > { %p176_p7 = scmp.ne.s32.totalorder %s6076_s29, %s6072_s28  ;;  %p167_p9 = scmp.eq.s32.totalorder %s166_s25, 0 }
  0x54   : > { %p177_p3 = scmp.eq.s32.totalorder %s6080_s30, 0  ;;  %p182_p1 = scmp.ne.s32.totalorder %s6072_s28, %s6068_s27 }
  0x55   : > { %p5570_p4 = scmp.lt.s32.totalorder %s6080_s30, 2  ;;  %p7123_p11 = scmp.eq.s32.totalorder %s6220_s1, 0 }
  0x56   : > { %s6301_s21 = scalar_select %p167_p9, %s6076_s29, %s169_s16  }
  0x57   : > { %p178_p10 = por %p177_p3, %p176_p7  ;;  %p6305_p12 = por %p7123_p11, %p182_p1 }
  0x58   : > { %7122 = sst [smem:[#allocation23_spill]] %s6301_s21  ;;  %s6310_s24 = sand.u32 1, %s6076_s29  }
  0x59   : > { %s7124_s23 = scalar_select %p6305_p12, 1, 0 }
  0x5a   : > { %s6313_s22 = sshll.u32 %s6080_s30, 4  ;;  %p6315_p13 = pnand %p5570_p4, %p178_p10 }
  0x5b   : > { %s627_s27 = sand.u32 1, %s6080_s30   ;;  %s7126_s9 = sld [smem:[#allocation28_spill]] }
  0x5c   : > { %s7125_s19 = scalar_select %p6315_p13, 1, 0 }
  0x5d   : > { %s630_s16 = scalar_lea.vmem [#allocation6], %s6310_s24  ;;  %s6084_s13 = smov [#allocation11]  }
  0x5e   : > { %s637_s25 = sshll.u32 %s630_s16, 4  ;;  %s6329_s15 = sshll.u32 %s6084_s13, 4  ;;  %s6327_s25 = int_to_ptr.vmem [resolvable:$true] %s637_s25  ;;  %s527_s15 = int_to_ptr.vmem [resolvable:$true] %s6329_s15 }
  0x5f   : > { %s6331_s21 = scalar_lea.sflag [#allocation7], %s627_s27  ;;  %p6337_p2 = pneg %p6315_p13 }
  0x61   : > { %s6324_s26 = scalar_lea.hbm %s7126_s9, %s6313_s22  ;;  %s5863_s16 = scalar_lea.hbm %s7126_s9, 32 }
  0x62   : > { %s5858_s29 = scalar_lea.hbm %s6324_s26, 16  ;;  %p5864_p9 = scmp.lt.u32.totalorder %s6324_s26, %s7126_s9 }
  0x63   : > { %p5859_p0 = scmp.ne.s32.totalorder %s6324_s26, %s5858_s29  ;;  %p5865_p3 = scmp.lt.u32.totalorder %s5863_s16, %s5858_s29 }
  0x64   : > { %s7127_s30 = scalar_select %p6337_p2, 1, 0 }
  0x65   : > { %p5861_p5 = pnand %p6337_p2, %p5859_p0  ;;  %p5866_p1 = por %p5865_p3, %p5864_p9 }
  0x66   : > { %p5867_p4 = scmp.lt.u32.totalorder %s5858_s29, %s6324_s26 }
  0x67   : > { %p5862_p7 = pneg %p5861_p5 }
  0x68   : > { %p5868_p10 = por %p5867_p4, %p5866_p1 }
  0x6a   : > { %p5869_p11 = pnand %p5868_p10, %p5862_p7 }
  0x6c   : > { %5872 = shalt.err (!%p5869_p11)
}
  0x6d   : > { %s5873_s27 = scalar_lea.vmem %s6327_s25, 16  ;;  %s6085_s10 = smov [#allocation6]  }
  0x6e   : > { %p5874_p0 = scmp.ne.s32.totalorder %s6327_s25, %s5873_s27  ;;  %s5878_s12 = sshll.u32 %s6085_s10, 4  ;;  %s5879_s12 = int_to_ptr.vmem [resolvable:$false] %s5878_s12 }
  0x6f   : > { %s5880_s0 = scalar_lea.vmem %s5879_s12, 32  ;;  %p5881_p6 = scmp.lt.s32.totalorder %s6327_s25, %s5879_s12 }
  0x70   : > { %p5876_p5 = pnand %p5874_p0, %p6337_p2  ;;  %p5882_p8 = scmp.lt.s32.totalorder %s5880_s0, %s5873_s27 }
  0x72   : > { %p5877_p12 = pneg %p5876_p5  ;;  %p5883_p9 = por %p5882_p8, %p5881_p6 }
  0x74   : > { %p5884_p3 = pnand %p5883_p9, %p5877_p12 }
  0x76   : > { %5887 = shalt.err (!%p5884_p3)
}
  0x77   : > { %5562 = dma.hbm_to_vmem [thread:$0]  (!%p6315_p13), %s6324_s26, 16, %s6327_s25, %s6331_s21  }
  0x78   : > { %s5888_s13 = scalar_lea.hbm %s7081_s14, 16  ;;  %p7128_p6 = scmp.ne.s32.totalorder %s7119_s18, 0 }
  0x79   : > { %p5889_p7 = scmp.ne.s32.totalorder %s7081_s14, %s5888_s13  ;;  %p5895_p1 = scmp.lt.u32.totalorder %s5888_s13, %s7081_s14 }
  0x7b   : > { %p5891_p8 = pnand %p5889_p7, %p7128_p6 }
  0x7d   : > { %p5892_p12 = pneg %p5891_p8 }
  0x7f   : > { %p5897_p4 = pnand %p5895_p1, %p5892_p12 }
  0x81   : > { %5900 = shalt.err (!%p5897_p4)
}
  0x82   : > { %s5901_s0 = scalar_lea.vmem %s527_s15, 16  ;;  %s5908_s26 = scalar_lea.vmem %s527_s15, 32 }
  0x83   : > { %p5902_p10 = scmp.ne.s32.totalorder %s527_s15, %s5901_s0  ;;  %p5909_p5 = scmp.lt.s32.totalorder %s527_s15, %s527_s15 }
  0x84   : > { %p5910_p9 = scmp.lt.s32.totalorder %s5908_s26, %s5901_s0 }
  0x85   : > { %p5904_p11 = pnand %p5902_p10, %p7128_p6 }
  0x86   : > { %p5911_p3 = por %p5910_p9, %p5909_p5 }
  0x87   : > { %p5905_p0 = pneg %p5904_p11 }
  0x89   : > { %p5912_p13 = pnand %p5911_p3, %p5905_p0 }
  0x8b   : > { %5915 = shalt.err (!%p5912_p13)
}
  0x8c   : > { %p7129_p7 = scmp.ne.s32.totalorder %s7117_s2, 0  ;;  %s6086_s29 = smov [#allocation14]  }
  0x8d   : > { %s551_s16 = sshll.u32 %s6086_s29, 4  ;;  %s5916_s27 = scalar_lea.hbm %s7084_s17, 16  ;;  %s552_s16 = int_to_ptr.vmem [resolvable:$true] %s551_s16 }
  0x8e   : > { %5549 = dma.hbm_to_vmem [thread:$0]  (!%p7129_p7), %s7081_s14, 16, %s527_s15, [#allocation10]  }
  0x8f   : > { %p5917_p8 = scmp.ne.s32.totalorder %s7084_s17, %s5916_s27  ;;  %p5923_p1 = scmp.lt.u32.totalorder %s5916_s27, %s7084_s17 }
  0x91   : > { %p5919_p13 = pnand %p5917_p8, %p7128_p6 }
  0x93   : > { %p5920_p12 = pneg %p5919_p13 }
  0x95   : > { %p5925_p4 = pnand %p5923_p1, %p5920_p12 }
  0x97   : > { %5928 = shalt.err (!%p5925_p4)
}
  0x98   : > { %s5929_s15 = scalar_lea.vmem %s552_s16, 16  ;;  %s5936_s9 = scalar_lea.vmem %s552_s16, 32 }
  0x99   : > { %p5930_p10 = scmp.ne.s32.totalorder %s552_s16, %s5929_s15  ;;  %p5937_p5 = scmp.lt.s32.totalorder %s552_s16, %s552_s16 }
  0x9a   : > { %p5938_p9 = scmp.lt.s32.totalorder %s5936_s9, %s5929_s15 }
  0x9b   : > { %p5932_p11 = pnand %p5930_p10, %p7128_p6 }
  0x9c   : > { %p5939_p3 = por %p5938_p9, %p5937_p5 }
  0x9d   : > { %p5933_p0 = pneg %p5932_p11 }
  0x9f   : > { %p5940_p2 = pnand %p5939_p3, %p5933_p0 }
  0xa1   : > { %5943 = shalt.err (!%p5940_p2)
}
  0xa2   : > { %5555 = dma.hbm_to_vmem [thread:$0]  (!%p7129_p7), %s7084_s17, 16, %s552_s16, [#allocation13]  }
  0xa3   : > { %s6402_s13 = scalar_lea.hbm %s7072_s5, %s6313_s22  ;;  %s593_s10 = scalar_lea.vmem [#allocation3], %s6310_s24 }
  0xa4   : > { %s600_s27 = sshll.u32 %s593_s10, 4  ;;  %s591_s2 = scalar_lea.sflag [#allocation4], %s6310_s24  ;;  %s601_s27 = int_to_ptr.vmem [resolvable:$true] %s600_s27 }
  0xa5   : > { %s5944_s12 = scalar_lea.hbm %s6402_s13, 16  ;;  %p7130_p6 = scmp.ne.s32.totalorder %s7127_s30, 0 }
  0xa6   : > { %p5945_p2 = scmp.ne.s32.totalorder %s6402_s13, %s5944_s12  ;;  %s5949_s26 = scalar_lea.hbm %s7072_s5, 32 }
  0xa7   : > { %p5950_p7 = scmp.lt.u32.totalorder %s6402_s13, %s7072_s5  ;;  %p5951_p12 = scmp.lt.u32.totalorder %s5949_s26, %s5944_s12 }
  0xa8   : > { %p5947_p8 = pnand %p5945_p2, %p7130_p6  ;;  %p5953_p4 = scmp.lt.u32.totalorder %s5944_s12, %s6402_s13 }
  0xa9   : > { %p5952_p1 = por %p5951_p12, %p5950_p7 }
  0xaa   : > { %p5948_p13 = pneg %p5947_p8 }
  0xab   : > { %p5954_p10 = por %p5953_p4, %p5952_p1 }
  0xad   : > { %p5955_p11 = pnand %p5954_p10, %p5948_p13 }
  0xaf   : > { %5958 = shalt.err (!%p5955_p11)
}
  0xb0   : > { %s5959_s8 = scalar_lea.vmem %s601_s27, 16  ;;  %s6087_s25 = smov [#allocation3]  }
  0xb1   : > { %p5960_p0 = scmp.ne.s32.totalorder %s601_s27, %s5959_s8  ;;  %s5964_s29 = sshll.u32 %s6087_s25, 4  ;;  %s5965_s29 = int_to_ptr.vmem [resolvable:$false] %s5964_s29 }
  0xb2   : > { %s5966_s18 = scalar_lea.vmem %s5965_s29, 32  ;;  %p5967_p3 = scmp.lt.s32.totalorder %s601_s27, %s5965_s29 }
  0xb3   : > { %p5962_p5 = pnand %p5960_p0, %p7130_p6  ;;  %p5968_p2 = scmp.lt.s32.totalorder %s5966_s18, %s5959_s8 }
  0xb5   : > { %p5963_p9 = pneg %p5962_p5  ;;  %p5969_p8 = por %p5968_p2, %p5967_p3 }
  0xb7   : > { %p5970_p7 = pnand %p5969_p8, %p5963_p9 }
  0xb9   : > { %5973 = shalt.err (!%p5970_p7)
}
  0xba   : > { %p7131_p12 = scmp.ne.s32.totalorder %s7125_s19, 0  ;;  %s6427_s0 = scalar_lea.hbm %s7078_s11, %s6313_s22 }
  0xbb   : > { %s655_s16 = scalar_lea.vmem [#allocation8], %s6310_s24  ;;  %s5974_s15 = scalar_lea.hbm %s6427_s0, 16 }
  0xbc   : > { %5559 = dma.hbm_to_vmem [thread:$0]  (!%p7131_p12), %s6402_s13, 16, %s601_s27, %s591_s2  }
  0xbd   : > { %s662_s26 = sshll.u32 %s655_s16, 4  ;;  %p5975_p13 = scmp.ne.s32.totalorder %s6427_s0, %s5974_s15  ;;  %s663_s26 = int_to_ptr.vmem [resolvable:$true] %s662_s26 }
  0xbe   : > { %s5979_s13 = scalar_lea.hbm %s7078_s11, 32  ;;  %p5980_p10 = scmp.lt.u32.totalorder %s6427_s0, %s7078_s11 }
  0xbf   : > { %p5977_p1 = pnand %p5975_p13, %p7130_p6  ;;  %p5981_p11 = scmp.lt.u32.totalorder %s5979_s13, %s5974_s15 }
  0xc0   : > { %p5983_p5 = scmp.lt.u32.totalorder %s5974_s15, %s6427_s0 }
  0xc1   : > { %p5978_p4 = pneg %p5977_p1  ;;  %p5982_p0 = por %p5981_p11, %p5980_p10 }
  0xc3   : > { %p5984_p9 = por %p5983_p5, %p5982_p0 }
  0xc5   : > { %p5985_p3 = pnand %p5984_p9, %p5978_p4 }
  0xc7   : > { %5988 = shalt.err (!%p5985_p3)
}
  0xc8   : > { %s5989_s24 = scalar_lea.vmem %s663_s26, 16  ;;  %s6088_s22 = smov [#allocation8]  }
  0xc9   : > { %p5990_p2 = scmp.ne.s32.totalorder %s663_s26, %s5989_s24  ;;  %s5994_s25 = sshll.u32 %s6088_s22, 4  ;;  %s5995_s25 = int_to_ptr.vmem [resolvable:$false] %s5994_s25 }
  0xca   : > { %s5996_s29 = scalar_lea.vmem %s5995_s25, 32  ;;  %p5997_p13 = scmp.lt.s32.totalorder %s663_s26, %s5995_s25 }
  0xcb   : > { %p5992_p8 = pnand %p5990_p2, %p7130_p6  ;;  %p5998_p1 = scmp.lt.s32.totalorder %s5996_s29, %s5989_s24 }
  0xcd   : > { %p5993_p7 = pneg %p5992_p8  ;;  %p5999_p12 = por %p5998_p1, %p5997_p13 }
  0xcf   : > { %p6000_p10 = pnand %p5999_p12, %p5993_p7 }
  0xd1   : > { %6003 = shalt.err (!%p6000_p10)
}
  0xd2   : > { %p7132_p11 = scmp.ne.s32.totalorder %s7125_s19, 0  ;;  %p7133_p4 = scmp.ne.s32.totalorder %s7116_s20, 0 }
  0xd3   : > { %s6451_s30 = sand.u32 (!%p7133_p4), 1, %s6072_s28   ;;  %p7134_p6 = scmp.ne.s32.totalorder (!%p7133_p4), %s7124_s23, 0 }
  0xd4   : > { %5565 = dma.hbm_to_vmem [thread:$0]  (!%p7132_p11), %s6427_s0, 16, %s663_s26, %s6331_s21  }
  0xd5   : > { %671 = sbr.rel (%p7133_p4) target bundleno = 5620 (0x15f4), region = 92  ;;  %s674_s18 = scalar_lea.sflag (!%p7133_p4), [#allocation4], %s6451_s30 }
  0xdc   : > { %6047 = dma.done.wait (%p7134_p6), %s674_s18, 16  }
  0xdd   : > { %6049 = vsyncadd (%p7134_p6), %s674_s18, 4294967280  ;;  %s681_s21 = sand.u32 1, %s6220_s1  }
  0xde   : > { %s682_s19 = scalar_lea.sflag [#allocation7], %s681_s21 }
  0xdf   : > { %6051 = dma.done.wait (%p7134_p6), %s682_s19, 32  }
  0xe0   : > { %6053 = vsyncadd (%p7134_p6), %s682_s19, 4294967264  ;;  %p7135_p12 = scmp.eq.s32.totalorder %s6220_s1, 0 }
  0xe2   : > { %6055 = dma.done.wait (%p7135_p12), [#allocation10], 32   ;;  %p7136_p0 = pmov %p7135_p12 }
  0xe4   : > { %6057 = vsyncadd (%p7136_p0), [#allocation10], 4294967264  ;;  %p7137_p5 = pmov %p7136_p0 }
  0xe5   : > { %p7138_p9 = pmov %p7136_p0 }
  0xe6   : > { %6059 = dma.done.wait (%p7137_p5), [#allocation13], 32  }
  0xe7   : > { %6061 = vsyncadd (%p7138_p9), [#allocation13], 4294967264  ;;  %p795_p3 = scmp.lt.s32.totalorder %s6220_s1, 1  ;;  %s7141_s20 = sld [smem:[#allocation27_spill]] }
  0xe8   : > { %s7142_s29 = sld [smem:[#allocation29_spill]]  ;;  %p7143_p2 = scmp.ne.s32.totalorder %s6220_s1, 0 }
  0xe9   : > { %s6476_s0 = scalar_select %p795_p3, %s6220_s1, 1 }
  0xea   : > { %830 = sbr.rel (%p7143_p2) target bundleno = 244 (0xf4), region = 124  ;;  %s7144_s27 = sld [smem:[#allocation24_spill]] (!%p7143_p2)  ;;  %vm835_vm0 = vcmask (!%p7143_p2), 261120  }
  0xeb   : > { %s4833_s2 = sshll.u32 %s6476_s0, 5  ;;  %s816_s9 = scalar_lea.vmem %s7074_s7, %s6476_s0 }
  0xec   : > { %s6494_s21 = scalar_lea.vmem %s7070_s3, %s4833_s2  ;;  %s6499_s16 = scalar_lea.vmem %s7071_s4, %s4833_s2 }
  0xed   : > { %s6508_s10 = scalar_lea.vmem %s7141_s20, %s4833_s2  ;;  %s4836_s24 = sshll.u32 %s6476_s0, 6 }
  0xee   : > { %s6514_s18 = scalar_lea.vmem %s7142_s29, %s4836_s24 }
  0xf0   : > { %s7145_s15 = smov (!%p7143_p2), %s7144_s27  ;;  %v831_v0 = vld [vmem:[%s7144_s27] sm:$0xff] (!%p7143_p2) }
  0xf1   : > { %v832_v1 = vld [vmem:[%s7145_s15 + $0x8] sm:$0xff]  ;;  %v833_v2 = vld [vmem:[%s7145_s15 + $0x10] sm:$0xff]  ;;  %836 = vst.msk [vmem:[#allocation2] sm:$0xff] %vm835_vm0, %v831_v0  ;;  %v834_v3 = vld [vmem:[%s7145_s15 + $0x18] sm:$0xff] }
  0xf2   : > { %837 = vst.msk [vmem:[#allocation2 + $0x8] sm:$0xff] %vm835_vm0, %v832_v1  ;;  %838 = vst.msk [vmem:[#allocation2 + $0x10] sm:$0xff] %vm835_vm0, %v833_v2 }
  0xf3   : > { %839 = vst.msk [vmem:[#allocation2 + $0x18] sm:$0xff] %vm835_vm0, %v834_v3 }
  0xf4 PF: > { %vm846_vm1 = vcmask 261120   ;;  %v920_v22 = vld [vmem:[%s6494_s21] sm:$0xff]  ;;  %v921_v23 = vld [vmem:[%s6494_s21 + $0x8] sm:$0xff]  ;;  %v922_v24 = vld [vmem:[%s6494_s21 + $0x10] sm:$0xff]  ;;  %s7146_s13 = sld [smem:[#allocation25_spill]]  ;;  %s7148_s19 = sld [smem:[#allocation26_spill]] }
  0xf5   : > { %v5315_v25 = vpack.c.bf16 %v921_v23, %v920_v22  ;;  %v923_v26 = vld [vmem:[%s6494_s21 + $0x18] sm:$0xff]  ;;  %vm1032_vm2 = vcmask 64512   ;;  %s6089_s12 = smov 88   ;;  %s6090_s26 = smov 96   ;;  %vm1118_vm4 = vcmask 130048   ;;  %vm3539_vm5 = vcmask 523264  }
  0xf6   : > { %v5319_v27 = vpack.c.bf16 %v923_v26, %v922_v24  ;;  %s6091_s20 = smov 120   ;;  %vm6575_vm3 = vmpackc.low %vm1032_vm2, %vm1032_vm2  ;;  %s6092_s2 = smov 80  }
  0xf7   : > { %5316 = vmatprep.subr.bf16.mxu1 %v5315_v25  ;;  %s6093_s25 = smov 112   ;;  %s6094_s8 = smov 72  }
  0xf8   : > { %5318 = vmatpush3.bf16.msra.mxu1 %v5315_v25  ;;  %s6095_s27 = smov 104   ;;  %s6096_s21 = smov 64  }
  0xf9   : > { %v6532_v5 = vld [vmem:[#allocation2 + $0x8] sm:$0xff]  ;;  %v842_v8 = vld [vmem:[#allocation2 + $0x10] sm:$0xff]  ;;  %5320 = vmatprep.subr.bf16.mxu1 %v5319_v27  ;;  %s6099_s22 = smov 40   ;;  %p4794_p8 = scmp.ne.s32.totalorder %s6220_s1, 1 }
  0xfa   : > { %v850_v7 = vsel %vm846_vm1, %v6532_v5, 0.0  ;;  %v853_v9 = vsel %vm846_vm1, %v842_v8, 0.0  ;;  %v843_v19 = vld [vmem:[#allocation2 + $0x18] sm:$0xff]  ;;  %s7147_s24 = scalar_lea.vmem %s7146_s13, %s6476_s0  ;;  %s7149_s23 = scalar_lea.vmem %s7148_s19, %s6476_s0  ;;  %vm6101_vm6 = vmmov (!%p4794_p8), 0   ;;  %vm3968_vm7 = vcmask (!%p4794_p8), 253952  }
  0xfb   : > { %v6530_v4 = vld [vmem:[#allocation2] sm:$0xff]  ;;  %v856_v21 = vsel %vm846_vm1, %v843_v19, 0.0  ;;  %s6097_s13 = smov 56   ;;  %s7153_s19 = scalar_lea.vmem %s7073_s6, %s6476_s0  ;;  %vm4062_vm8 = vcmask (!%p4794_p8), 24576  }
  0xfc   : > { %v847_v6 = vsel %vm846_vm1, %v6530_v4, 0.0  ;;  %5322 = vmatpush3.bf16.msra.mxu1 %v5319_v27  ;;  %v4711_v44 = vld [vmem:[%s7147_s24] ss:$0 sm:$0xff]  ;;  %s6098_s24 = smov 48   ;;  %s7154_s0 = scalar_lea.vmem [#allocation6], %s6451_s30 }
  0xfd   : > { %848 = vadd.xlane.f32.xlu0 %v847_v6  ;;  %v4712_v47 = vld [vmem:[%s7149_s23] ss:$0 sm:$0xff]  ;;  %s7157_s23 = sld [smem:[#allocation33_spill]] (!%p4794_p8) }
 0x101   : > { %851 = vadd.xlane.f32.xlu0 %v850_v7 }
 0x105   : > { %854 = vadd.xlane.f32.xlu0 %v853_v9 }
 0x18a   : > { %v849_v10 = vpop.xlane.xlu0 %848 }
 0x18b   : > { %v860_v11 = vmul.f32 0.03125, %v849_v10 }
 0x18d   : > { %v864_v12 = vsub.f32 %v6530_v4, %v860_v11 }
 0x18e   : > { %v852_v13 = vpop.xlane.xlu0 %851 }
 0x18f   : > { %v861_v14 = vmul.f32 0.03125, %v852_v13  ;;  %v868_v15 = vmul.f32 %v864_v12, %v864_v12 }
 0x191   : > { %v865_v16 = vsub.f32 %v6532_v5, %v861_v14  ;;  %v872_v17 = vsel %vm846_vm1, %v868_v15, 0.0 }
 0x192   : > { %873 = vadd.xlane.f32.xlu1 %v872_v17  ;;  %v855_v28 = vpop.xlane.xlu0 %854 }
 0x193   : > { %v869_v18 = vmul.f32 %v865_v16, %v865_v16  ;;  %v862_v29 = vmul.f32 0.03125, %v855_v28 }
 0x195   : > { %v875_v20 = vsel %vm846_vm1, %v869_v18, 0.0  ;;  %v866_v30 = vsub.f32 %v842_v8, %v862_v29 }
 0x196   : > { %876 = vadd.xlane.f32.xlu1 %v875_v20 }
 0x197   : > { %v870_v31 = vmul.f32 %v866_v30, %v866_v30 }
 0x199   : > { %v878_v32 = vsel %vm846_vm1, %v870_v31, 0.0 }
 0x19a   : > { %857 = vadd.xlane.f32.xlu1 %v856_v21  ;;  %879 = vadd.xlane.f32.xlu0 %v878_v32 }
 0x21f   : > { %v874_v33 = vpop.xlane.xlu1 %873 }
 0x220   : > { %v884_v34 = vmul.f32 0.03125, %v874_v33 }
 0x222   : > { %v888_v35 = vadd.f32 1e-05, %v884_v34 }
 0x223   : > { %v877_v36 = vpop.xlane.xlu1 %876 }
 0x224   : > { %5708 = vrsqrt.f32 %v888_v35  ;;  %v885_v37 = vmul.f32 0.03125, %v877_v36 }
 0x226   : > { %v889_v38 = vadd.f32 1e-05, %v885_v37 }
 0x227   : > { %v858_v39 = vpop.xlane.xlu1 %857  ;;  %v880_v54 = vpop.xlane.xlu0 %879 }
 0x228   : > { %5710 = vrsqrt.f32 %v889_v38  ;;  %v863_v40 = vmul.f32 0.03125, %v858_v39  ;;  %v886_v55 = vmul.f32 0.03125, %v880_v54 }
 0x22a   : > { %v867_v41 = vsub.f32 %v843_v19, %v863_v40  ;;  %v890_v56 = vadd.f32 1e-05, %v886_v55 }
 0x22c   : > { %v871_v42 = vmul.f32 %v867_v41, %v867_v41  ;;  %5712 = vrsqrt.f32 %v890_v56 }
 0x22e   : > { %v5709_v43 = vpop.eup %5708  ;;  %v881_v45 = vsel %vm846_vm1, %v871_v42, 0.0 }
 0x22f   : > { %v896_v46 = vmul.f32 %v5709_v43, %v864_v12  ;;  %882 = vadd.xlane.f32.xlu1 %v881_v45 }
 0x231   : > { %v906_v48 = vmul.f32 %v4711_v44, %v896_v46 }
 0x232   : > { %v5711_v49 = vpop.eup %5710 }
 0x233   : > { %v916_v50 = vadd.f32 %v4712_v47, %v906_v48  ;;  %v897_v51 = vmul.f32 %v5711_v49, %v865_v16 }
 0x235   : > { %5011 = vmatprep.mubr.msk.f32.mxu1 %vm846_vm1, %v916_v50  ;;  %v907_v52 = vmul.f32 %v4711_v44, %v897_v51 }
 0x236   : > { %v5713_v57 = vpop.eup %5712 }
 0x237   : > { %v917_v53 = vadd.f32 %v4712_v47, %v907_v52  ;;  %v898_v58 = vmul.f32 %v5713_v57, %v866_v30 }
 0x239   : > { %5012 = vmatmul.mubr.msk.f32.vlgmr.msra.gmra.mrb[0].mxu1 %vm846_vm1, %v917_v53  ;;  %v908_v59 = vmul.f32 %v4711_v44, %v898_v58 }
 0x23b   : > { %v918_v60 = vadd.f32 %v4712_v47, %v908_v59 }
 0x23d   : > { %5014 = vmatprep.mubr.msk.f32.mxu1 %vm846_vm1, %v918_v60 }
 0x2bc   : > { %v883_v61 = vpop.xlane.xlu1 %882 }
 0x2bd   : > { %v887_v62 = vmul.f32 0.03125, %v883_v61 }
 0x2bf   : > { %v891_v63 = vadd.f32 1e-05, %v887_v62 }
 0x2c1   : > { %5714 = vrsqrt.f32 %v891_v63 }
 0x2cb   : > { %v5715_v0 = vpop.eup %5714 }
 0x2cc   : > { %v899_v1 = vmul.f32 %v5715_v0, %v867_v41 }
 0x2ce   : > { %v909_v2 = vmul.f32 %v4711_v44, %v899_v1 }
 0x2d0   : > { %v919_v3 = vadd.f32 %v4712_v47, %v909_v2 }
 0x2d2   : > { %5015 = vmatmul.mubr.msk.f32.gmra.mrb[2].mxu1 %vm846_vm1, %v919_v3 }
 0x30c   : > { %v5013_v6 = vpop.f32.mrb[0].mxu1 }
 0x30d   : > { %v1002_v7 = vpop.f32.mrb[1].mxu1 }
 0x30e   : > { %5021 = vmatprep.mubr.msk.f32.mxu1 %vm1032_vm2, %v1002_v7  ;;  %v6565_v8 = vpack.i.bf16 %v5013_v6, %v1002_v7 }
 0x310   : > { %5634 = vrot.lane.b32.xlu1 %v6565_v8, %s6089_s12  ;;  %5629 = vrot.lane.b32.xlu0 %v6565_v8, %s6090_s26 }
 0x314   : > { %1317 = vrot.lane.b32.xlu1 %v1002_v7, %s6091_s20 }
 0x318   : > { %1319 = vrot.lane.b32.xlu1 %v5013_v6, %s6091_s20 }
 0x382   : > { %v5635_v9 = vpop.permute.xlu1 %5634  ;;  %v5630_v10 = vpop.permute.xlu0 %5629 }
 0x383   : > { %v5637_v11 = vunpack.i.h.bf16 %v5635_v9  ;;  %v5636_v12 = vunpack.i.l.bf16 %v5635_v9  ;;  %v5632_v13 = vunpack.i.h.bf16 %v5630_v10  ;;  %v5631_v14 = vunpack.i.l.bf16 %v5630_v10 }
 0x385   : > { %v5323_v16 = vpack.c.bf16 %v5632_v13, %v5631_v14  ;;  %v5333_v17 = vpack.c.bf16 %v5637_v11, %v5636_v12 }
 0x386   : > { %v1318_v18 = vpop.permute.xlu1 %1317 }
 0x387   : > { %5325 = vmatprep.subr.msk.bf16.mxu1 %vm6575_vm3, %v5323_v16 }
 0x388   : > { %5328 = vmatpush3.bf16.xpose.msk.msra.mxu1 %vm6575_vm3, %v5323_v16 }
 0x389   : > { %5335 = vmatprep.subr.msk.bf16.mxu1 %vm6575_vm3, %v5333_v17 }
 0x38a   : > { %v1320_v19 = vpop.permute.xlu1 %1319 }
 0x38f   : > { %5022 = vmatmul.mubr.msk.f32.vlgmr.msra.gmra.mrb[4].mxu1 %vm1032_vm2, %v5013_v6 }
 0x390   : > { %5338 = vmatpush3.bf16.xpose.msk.msra.mxu1 %vm6575_vm3, %v5333_v17  ;;  %5040 = vmatprep.mubr.msk.f32.mxu1 %vm1032_vm2, %v1318_v18 }
 0x397   : > { %5041 = vmatmul.mubr.msk.f32.vlgmr.msra.gmra.mrb[6].mxu1 %vm1032_vm2, %v1320_v19 }
 0x3a5   : > { %v6590_v20 = vpop.f32.mrb[2].mxu1 }
 0x3a6   : > { %v6592_v21 = vpop.f32.mrb[3].mxu1 }
 0x3a7   : > { %v6596_v22 = vpack.i.bf16 %v6590_v20, %v6592_v21 }
 0x462   : > { %v5023_v23 = vpop.f32.mrb[4].mxu1 }
 0x463   : > { %v1117_v24 = vmul.f32 0.35355338, %v5023_v23  ;;  %v1107_v25 = vpop.f32.mrb[5].mxu1 }
 0x464   : > { %v1116_v26 = vmul.f32 0.35355338, %v1107_v25 }
 0x465   : > { %v1122_v27 = vsel %vm1118_vm4, %v1117_v24, -inf }
 0x466   : > { %1123 = vmax.xlane.f32.xlu1 %v1122_v27  ;;  %v1119_v28 = vsel %vm1118_vm4, %v1116_v26, -inf }
 0x467   : > { %1120 = vmax.xlane.f32.xlu0 %v1119_v28 }
 0x46a   : > { %v5042_v29 = vpop.f32.mrb[6].mxu1 }
 0x46b   : > { %v1399_v30 = vpop.f32.mrb[7].mxu1  ;;  %v1409_v31 = vmul.f32 0.35355338, %v5042_v29 }
 0x46c   : > { %v1408_v56 = vmul.f32 0.35355338, %v1399_v30 }
 0x46d   : > { %v1413_v32 = vsel %vm1118_vm4, %v1409_v31, -inf }
 0x46e   : > { %v1410_v58 = vsel %vm1118_vm4, %v1408_v56, -inf }
 0x477   : > { %5644 = vrot.lane.b32.xlu1 %v6565_v8, %s6092_s2 }
 0x47b   : > { %1602 = vrot.lane.b32.xlu1 %v1002_v7, %s6093_s25 }
 0x47f   : > { %1604 = vrot.lane.b32.xlu1 %v5013_v6, %s6093_s25 }
 0x4a3   : > { %1414 = vmax.xlane.f32.xlu1 %v1413_v32 }
 0x4b4   : > { %5654 = vrot.lane.b32.xlu1 %v6565_v8, %s6094_s8 }
 0x4b8   : > { %1887 = vrot.lane.b32.xlu1 %v1002_v7, %s6095_s27 }
 0x4bc   : > { %1889 = vrot.lane.b32.xlu1 %v5013_v6, %s6095_s27 }
 0x4f3   : > { %v1124_v33 = vpop.xlane.xlu1 %1123 }
 0x4f4   : > { %v1126_v34 = vsub.f32 %v1117_v24, %v1124_v33  ;;  %v1121_v35 = vpop.xlane.xlu0 %1120  ;;  %v6639_v24 = vld [vmem:[%s6499_s16] sm:$0xff] }
 0x4f5   : > { %v1125_v36 = vsub.f32 %v1116_v26, %v1121_v35 }
 0x4f6   : > { %v1129_v37 = vmul.f32 1.442695, %v1126_v34 }
 0x4f7   : > { %v1127_v38 = vmul.f32 1.442695, %v1125_v36  ;;  %v5645_v39 = vpop.permute.xlu1 %5644 }
 0x4f8   : > { %5716 = vpow2.f32 %v1129_v37  ;;  %v5647_v40 = vunpack.i.h.bf16 %v5645_v39  ;;  %v5646_v41 = vunpack.i.l.bf16 %v5645_v39 }
 0x4f9   : > { %5718 = vpow2.f32 %v1127_v38 }
 0x4fa   : > { %v5343_v42 = vpack.c.bf16 %v5647_v40, %v5646_v41 }
 0x4fb   : > { %v1603_v43 = vpop.permute.xlu1 %1602 }
 0x4fc   : > { %5345 = vmatprep.subr.msk.bf16.mxu1 %vm6575_vm3, %v5343_v42  ;;  %5059 = vmatprep.mubr.msk.f32.mxu1 %vm1032_vm2, %v1603_v43 }
 0x4fd   : > { %5348 = vmatpush3.bf16.xpose.msk.msra.mxu1 %vm6575_vm3, %v5343_v42 }
 0x4ff   : > { %v1605_v45 = vpop.permute.xlu1 %1604 }
 0x502   : > { %v5717_v44 = vpop.eup %5716 }
 0x503   : > { %v1134_v46 = vsel %vm1118_vm4, %v5717_v44, 0.0  ;;  %v5719_v47 = vpop.eup %5718 }
 0x504   : > { %5060 = vmatmul.mubr.msk.f32.vlgmr.msra.gmra.mrb[8].mxu1 %vm1032_vm2, %v1605_v45  ;;  %1135 = vadd.xlane.f32.xlu0 %v1134_v46  ;;  %v1131_v48 = vsel %vm1118_vm4, %v5719_v47, 0.0 }
 0x508   : > { %1132 = vadd.xlane.f32.xlu0 %v1131_v48 }
 0x51e   : > { %5639 = vrot.lane.b32.xlu0 %v6565_v8, %s6096_s21 }
 0x530   : > { %v1415_v49 = vpop.xlane.xlu1 %1414 }
 0x531   : > { %v1417_v50 = vsub.f32 %v1409_v31, %v1415_v49 }
 0x533   : > { %v1420_v51 = vmul.f32 1.442695, %v1417_v50 }
 0x534   : > { %v5655_v52 = vpop.permute.xlu1 %5654 }
 0x535   : > { %5720 = vpow2.f32 %v1420_v51  ;;  %v5657_v53 = vunpack.i.h.bf16 %v5655_v52  ;;  %v5656_v54 = vunpack.i.l.bf16 %v5655_v52 }
 0x537   : > { %v5353_v55 = vpack.c.bf16 %v5657_v53, %v5656_v54 }
 0x538   : > { %v1888_v57 = vpop.permute.xlu1 %1887 }
 0x539   : > { %5355 = vmatprep.subr.msk.bf16.mxu1 %vm6575_vm3, %v5353_v55  ;;  %5078 = vmatprep.mubr.msk.f32.mxu1 %vm1032_vm2, %v1888_v57  ;;  %v6661_v57 = vld [vmem:[%s6499_s16 + $0x8] sm:$0xff] }
 0x53a   : > { %5358 = vmatpush3.bf16.xpose.msk.msra.mxu1 %vm6575_vm3, %v5353_v55 }
 0x53c   : > { %v1890_v60 = vpop.permute.xlu1 %1889 }
 0x53d   : > { %1411 = vmax.xlane.f32.xlu0 %v1410_v58 }
 0x53f   : > { %v6625_v59 = vpop.eup %5720 }
 0x540   : > { %v1425_v61 = vsel %vm1118_vm4, %v6625_v59, 0.0 }
 0x541   : > { %5079 = vmatmul.mubr.msk.f32.vlgmr.msra.gmra.mrb[10].mxu1 %vm1032_vm2, %v1890_v60  ;;  %1426 = vadd.xlane.f32.xlu0 %v1425_v61 }
 0x542   : > { %5097 = vmatprep.mubr.msk.f32.mxu1 %vm1032_vm2, %v6592_v21 }
 0x591   : > { %v1136_v62 = vpop.xlane.xlu0 %1135 }
 0x592   : > { %5722 = vrcp.f32 %v1136_v62 }
 0x595   : > { %v1133_v63 = vpop.xlane.xlu0 %1132 }
 0x596   : > { %5724 = vrcp.f32 %v1133_v63 }
 0x599   : > { %v5640_v0 = vpop.permute.xlu0 %5639 }
 0x59a   : > { %v5642_v1 = vunpack.i.h.bf16 %v5640_v0  ;;  %v5641_v2 = vunpack.i.l.bf16 %v5640_v0 }
 0x59c   : > { %v5329_v3 = vpack.c.bf16 %v5642_v1, %v5641_v2  ;;  %v5723_v6 = vpop.eup %5722 }
 0x59d   : > { %v1140_v10 = vmul.f32 %v5723_v6, %v5717_v44 }
 0x59e   : > { %5330 = vmatprep.subr.bf16.mxu0 %v5329_v3 }
 0x59f   : > { %5332 = vmatpush3.bf16.msra.mxu0 %v5329_v3 }
 0x5a0   : > { %v5725_v7 = vpop.eup %5724  ;;  %5031 = vmatprep.subr.mxu0 %v6639_v24 }
 0x5a1   : > { %v1139_v9 = vmul.f32 %v5725_v7, %v5719_v47 }
 0x5a3   : > { %5028 = vmatprep.mubr.msk.f32.mxu0 %vm1118_vm4, %v1139_v9 }
 0x5a4   : > { %5029 = vmatmul.mubr.msk.f32.vlgmr.msra.gmra.mrb[0].mxu0 %vm1118_vm4, %v1140_v10 }
 0x5a5   : > { %5032 = vmatpush3.msra.mxu0 %v6639_v24 }
 0x5ca   : > { %v1412_v11 = vpop.xlane.xlu0 %1411 }
 0x5cb   : > { %v1416_v12 = vsub.f32 %v1408_v56, %v1412_v11 }
 0x5cd   : > { %v1418_v13 = vmul.f32 1.442695, %v1416_v12 }
 0x5ce   : > { %v1427_v31 = vpop.xlane.xlu0 %1426 }
 0x5cf   : > { %5726 = vpow2.f32 %v1418_v13 }
 0x5d7   : > { %v5061_v14 = vpop.f32.mrb[8].mxu1 }
 0x5d8   : > { %v1694_v16 = vmul.f32 0.35355338, %v5061_v14  ;;  %v1684_v17 = vpop.f32.mrb[9].mxu1 }
 0x5d9   : > { %v5727_v18 = vpop.eup %5726  ;;  %v1693_v25 = vmul.f32 0.35355338, %v1684_v17 }
 0x5da   : > { %v1698_v19 = vsel %vm1118_vm4, %v1694_v16, -inf  ;;  %v1422_v23 = vsel %vm1118_vm4, %v5727_v18, 0.0 }
 0x5db   : > { %1699 = vmax.xlane.f32.xlu1 %v1698_v19  ;;  %1423 = vadd.xlane.f32.xlu0 %v1422_v23  ;;  %v1695_v26 = vsel %vm1118_vm4, %v1693_v25, -inf  ;;  %v6680_v19 = vld [vmem:[%s6499_s16 + $0x10] sm:$0xff] }
 0x5ec   : > { %5664 = vrot.lane.b32.xlu1 %v6596_v22, %s6090_s26  ;;  %s7156_s26 = sld [smem:[#allocation30_spill]] (!%p4794_p8) }
 0x5f1   : > { %5649 = vrot.lane.b32.xlu0 %v6565_v8, %s6097_s13 }
 0x610   : > { %1696 = vmax.xlane.f32.xlu0 %v1695_v26 }
 0x614   : > { %v5080_v27 = vpop.f32.mrb[10].mxu1 }
 0x615   : > { %v1969_v28 = vpop.f32.mrb[11].mxu1  ;;  %v1979_v61 = vmul.f32 0.35355338, %v5080_v27 }
 0x616   : > { %v1978_v29 = vmul.f32 0.35355338, %v1969_v28 }
 0x617   : > { %v1983_v62 = vsel %vm1118_vm4, %v1979_v61, -inf }
 0x618   : > { %v1980_v30 = vsel %vm1118_vm4, %v1978_v29, -inf }
 0x619   : > { %1981 = vmax.xlane.f32.xlu1 %v1980_v30 }
 0x668   : > { %v1700_v32 = vpop.xlane.xlu1 %1699  ;;  %v1424_v33 = vpop.xlane.xlu0 %1423 }
 0x669   : > { %v1702_v34 = vsub.f32 %v1694_v16, %v1700_v32  ;;  %5728 = vrcp.f32 %v1424_v33 }
 0x66b   : > { %v1705_v35 = vmul.f32 1.442695, %v1702_v34 }
 0x66c   : > { %v5665_v36 = vpop.permute.xlu1 %5664  ;;  %v5650_v37 = vpop.permute.xlu0 %5649 }
 0x66d   : > { %5730 = vpow2.f32 %v1705_v35  ;;  %v5667_v38 = vunpack.i.h.bf16 %v5665_v36  ;;  %v5666_v39 = vunpack.i.l.bf16 %v5665_v36  ;;  %v5652_v40 = vunpack.i.h.bf16 %v5650_v37 }
 0x66e   : > { %v5651_v41 = vunpack.i.l.bf16 %v5650_v37  ;;  %5732 = vrcp.f32 %v1427_v31 }
 0x66f   : > { %v5363_v42 = vpack.c.bf16 %v5667_v38, %v5666_v39 }
 0x670   : > { %v5339_v43 = vpack.c.bf16 %v5652_v40, %v5651_v41 }
 0x671   : > { %5365 = vmatprep.subr.msk.bf16.mxu1 %vm6575_vm3, %v5363_v42 }
 0x672   : > { %5340 = vmatprep.subr.bf16.mxu0 %v5339_v43  ;;  %5368 = vmatpush3.bf16.xpose.msk.msra.mxu1 %vm6575_vm3, %v5363_v42 }
 0x673   : > { %v5729_v44 = vpop.eup %5728 }
 0x674   : > { %v1430_v50 = vmul.f32 %v5729_v44, %v5727_v18 }
 0x677   : > { %v5731_v45 = vpop.eup %5730  ;;  %v5030_v46 = vpop.f32.mrb[0].mxu0 }
 0x678   : > { %v1219_v47 = vpop.f32.mrb[1].mxu0  ;;  %v1710_v48 = vsel %vm1118_vm4, %v5731_v45, 0.0  ;;  %v5733_v49 = vpop.eup %5732 }
 0x679   : > { %5098 = vmatmul.mubr.msk.f32.vlgmr.msra.gmra.mrb[12].mxu1 %vm1032_vm2, %v6590_v20  ;;  %1711 = vadd.xlane.f32.xlu0 %v1710_v48  ;;  %v1431_v51 = vmul.f32 %v5733_v49, %v6625_v59 }
 0x67a   : > { %5033 = vmatprep.mubr.msk.f32.mxu0 %vm1032_vm2, %v1219_v47 }
 0x67b   : > { %5034 = vmatmul.mubr.msk.f32.vlgmr.msra.gmra.mrb[2].mxu0 %vm1032_vm2, %v5030_v46 }
 0x67c   : > { %5342 = vmatpush3.bf16.msra.mxu0 %v5339_v43  ;;  %5047 = vmatprep.mubr.msk.f32.mxu0 %vm1118_vm4, %v1430_v50 }
 0x67d   : > { %5050 = vmatprep.subr.mxu0 %v6661_v57 }
 0x67f   : > { %5048 = vmatmul.mubr.msk.f32.vlgmr.msra.gmra.mrb[4].mxu0 %vm1118_vm4, %v1431_v51 }
 0x680   : > { %5051 = vmatpush3.msra.mxu0 %v6661_v57 }
 0x69d   : > { %v1697_v52 = vpop.xlane.xlu0 %1696 }
 0x69e   : > { %v1701_v53 = vsub.f32 %v1693_v25, %v1697_v52 }
 0x6a0   : > { %v1703_v54 = vmul.f32 1.442695, %v1701_v53 }
 0x6a2   : > { %5734 = vpow2.f32 %v1703_v54 }
 0x6a6   : > { %v1982_v58 = vpop.xlane.xlu1 %1981 }
 0x6a7   : > { %v1986_v59 = vsub.f32 %v1978_v29, %v1982_v58 }
 0x6a9   : > { %v1988_v60 = vmul.f32 1.442695, %v1986_v59 }
 0x6ab   : > { %5736 = vpow2.f32 %v1988_v60 }
 0x6ac   : > { %v5735_v55 = vpop.eup %5734 }
 0x6ad   : > { %v1707_v56 = vsel %vm1118_vm4, %v5735_v55, 0.0 }
 0x6ae   : > { %1708 = vadd.xlane.f32.xlu0 %v1707_v56 }
 0x6b5   : > { %v6668_v63 = vpop.eup %5736 }
 0x6b6   : > { %v1992_v0 = vsel %vm1118_vm4, %v6668_v63, 0.0 }
 0x6c4   : > { %5659 = vrot.lane.b32.xlu0 %v6565_v8, %s6098_s24 }
 0x6e3   : > { %1984 = vmax.xlane.f32.xlu0 %v1983_v62 }
 0x6e7   : > { %1993 = vadd.xlane.f32.xlu0 %v1992_v0 }
 0x6fd   : > { %5669 = vrot.lane.b32.xlu0 %v6565_v8, %s6099_s22 }
 0x706   : > { %v1712_v1 = vpop.xlane.xlu0 %1711 }
 0x73b   : > { %v1709_v2 = vpop.xlane.xlu0 %1708 }
 0x73c   : > { %5738 = vrcp.f32 %v1709_v2 }
 0x73d   : > { %5740 = vrcp.f32 %v1712_v1 }
 0x73f   : > { %v5660_v3 = vpop.permute.xlu0 %5659 }
 0x740   : > { %v5662_v6 = vunpack.i.h.bf16 %v5660_v3  ;;  %v5661_v7 = vunpack.i.l.bf16 %v5660_v3  ;;  %v6722_v3 = vld [vmem:[%s6499_s16 + $0x18] sm:$0xff]  ;;  %s7152_s16 = scalar_lea.vmem [#allocation3], %s6451_s30 }
 0x742   : > { %v5349_v9 = vpack.c.bf16 %v5662_v6, %v5661_v7 }
 0x744   : > { %5350 = vmatprep.subr.bf16.mxu0 %v5349_v9 }
 0x746   : > { %v5739_v14 = vpop.eup %5738 }
 0x747   : > { %v5741_v17 = vpop.eup %5740  ;;  %v1715_v18 = vmul.f32 %v5739_v14, %v5735_v55 }
 0x748   : > { %v1716_v23 = vmul.f32 %v5741_v17, %v5731_v45 }
 0x74c   : > { %v5099_v10 = vpop.f32.mrb[12].mxu1 }
 0x74d   : > { %v2256_v11 = vpop.f32.mrb[13].mxu1  ;;  %v2266_v35 = vmul.f32 0.35355338, %v5099_v10 }
 0x74e   : > { %v6674_v12 = vmul.f32 0.35355338, %v2256_v11 }
 0x74f   : > { %v2270_v36 = vsel %vm1118_vm4, %v2266_v35, -inf }
 0x750   : > { %v2267_v13 = vsel %vm1118_vm4, %v6674_v12, -inf }
 0x751   : > { %2268 = vmax.xlane.f32.xlu0 %v2267_v13 }
 0x752   : > { %v5049_v8 = vpop.f32.mrb[4].mxu0 }
 0x753   : > { %v1510_v16 = vpop.f32.mrb[5].mxu0 }
 0x754   : > { %5052 = vmatprep.mubr.msk.f32.mxu0 %vm1032_vm2, %v1510_v16 }
 0x755   : > { %5053 = vmatmul.mubr.msk.f32.vlgmr.msra.gmra.mrb[2].mxu0 %vm1032_vm2, %v5049_v8 }
 0x756   : > { %5352 = vmatpush3.bf16.msra.mxu0 %v5349_v9  ;;  %5066 = vmatprep.mubr.msk.f32.mxu0 %vm1118_vm4, %v1715_v18 }
 0x757   : > { %5069 = vmatprep.subr.mxu0 %v6680_v19 }
 0x759   : > { %5067 = vmatmul.mubr.msk.f32.vlgmr.msra.gmra.mrb[6].mxu0 %vm1118_vm4, %v1716_v23 }
 0x75a   : > { %5070 = vmatpush3.msra.mxu0 %v6680_v19 }
 0x770   : > { %v1985_v25 = vpop.xlane.xlu0 %1984 }
 0x771   : > { %v1987_v26 = vsub.f32 %v1979_v61, %v1985_v25 }
 0x773   : > { %v1990_v27 = vmul.f32 1.442695, %v1987_v26 }
 0x774   : > { %v1994_v28 = vpop.xlane.xlu0 %1993 }
 0x775   : > { %5742 = vpow2.f32 %v1990_v27 }
 0x776   : > { %5744 = vrcp.f32 %v1994_v28 }
 0x778   : > { %v5670_v29 = vpop.permute.xlu0 %5669 }
 0x779   : > { %v5672_v30 = vunpack.i.h.bf16 %v5670_v29  ;;  %v5671_v31 = vunpack.i.l.bf16 %v5670_v29 }
 0x77b   : > { %v5359_v32 = vpack.c.bf16 %v5672_v30, %v5671_v31 }
 0x77d   : > { %5360 = vmatprep.subr.bf16.mxu0 %v5359_v32 }
 0x77f   : > { %v5743_v33 = vpop.eup %5742 }
 0x780   : > { %v1995_v34 = vsel %vm1118_vm4, %v5743_v33, 0.0  ;;  %v5745_v44 = vpop.eup %5744 }
 0x781   : > { %1996 = vadd.xlane.f32.xlu1 %v1995_v34  ;;  %v2000_v48 = vmul.f32 %v5745_v44, %v6668_v63 }
 0x792   : > { %5674 = vrot.lane.b32.xlu1 %v6596_v22, %s6089_s12 }
 0x796   : > { %2459 = vrot.lane.b32.xlu1 %v6592_v21, %s6091_s20 }
 0x79a   : > { %2461 = vrot.lane.b32.xlu1 %v6590_v20, %s6091_s20 }
 0x7be   : > { %2271 = vmax.xlane.f32.xlu1 %v2270_v36 }
 0x7cf   : > { %5684 = vrot.lane.b32.xlu1 %v6596_v22, %s6092_s2 }
 0x7d3   : > { %2744 = vrot.lane.b32.xlu1 %v6592_v21, %s6093_s25 }
 0x7d7   : > { %2746 = vrot.lane.b32.xlu1 %v6590_v20, %s6093_s25 }
 0x7de   : > { %v2269_v50 = vpop.xlane.xlu0 %2268 }
 0x7df   : > { %v2273_v51 = vsub.f32 %v6674_v12, %v2269_v50 }
 0x7e1   : > { %v2275_v54 = vmul.f32 1.442695, %v2273_v51 }
 0x80e   : > { %v1997_v37 = vpop.xlane.xlu1 %1996 }
 0x80f   : > { %5746 = vrcp.f32 %v1997_v37 }
 0x812   : > { %v5675_v38 = vpop.permute.xlu1 %5674 }
 0x813   : > { %v5677_v39 = vunpack.i.h.bf16 %v5675_v38  ;;  %v5676_v40 = vunpack.i.l.bf16 %v5675_v38 }
 0x815   : > { %v5373_v41 = vpack.c.bf16 %v5677_v39, %v5676_v40 }
 0x816   : > { %v2460_v42 = vpop.permute.xlu1 %2459 }
 0x817   : > { %5375 = vmatprep.subr.msk.bf16.mxu1 %vm6575_vm3, %v5373_v41  ;;  %5116 = vmatprep.mubr.msk.f32.mxu1 %vm1032_vm2, %v2460_v42 }
 0x818   : > { %5378 = vmatpush3.bf16.xpose.msk.msra.mxu1 %vm6575_vm3, %v5373_v41 }
 0x819   : > { %v5747_v47 = vpop.eup %5746 }
 0x81a   : > { %v2462_v43 = vpop.permute.xlu1 %2461  ;;  %v2001_v49 = vmul.f32 %v5747_v47, %v5743_v33 }
 0x81f   : > { %5117 = vmatmul.mubr.msk.f32.vlgmr.msra.gmra.mrb[14].mxu1 %vm1032_vm2, %v2462_v43 }
 0x82c   : > { %v5068_v45 = vpop.f32.mrb[6].mxu0 }
 0x82d   : > { %v1795_v46 = vpop.f32.mrb[7].mxu0 }
 0x82e   : > { %5071 = vmatprep.mubr.msk.f32.mxu0 %vm1032_vm2, %v1795_v46 }
 0x82f   : > { %5072 = vmatmul.mubr.msk.f32.vlgmr.msra.gmra.mrb[2].mxu0 %vm1032_vm2, %v5068_v45 }
 0x830   : > { %5362 = vmatpush3.bf16.msra.mxu0 %v5359_v32  ;;  %5085 = vmatprep.mubr.msk.f32.mxu0 %vm1118_vm4, %v2000_v48 }
 0x831   : > { %5088 = vmatprep.subr.mxu0 %v6722_v3 }
 0x833   : > { %5086 = vmatmul.mubr.msk.f32.vlgmr.msra.gmra.mrb[8].mxu0 %vm1118_vm4, %v2001_v49 }
 0x834   : > { %5089 = vmatpush3.msra.mxu0 %v6722_v3 }
 0x84b   : > { %v2272_v52 = vpop.xlane.xlu1 %2271 }
 0x84c   : > { %v2274_v53 = vsub.f32 %v2266_v35, %v2272_v52 }
 0x84e   : > { %v2277_v55 = vmul.f32 1.442695, %v2274_v53  ;;  %v6760_v53 = vld [vmem:[%s7152_s16] ss:$0 sm:$0xff] }
 0x84f   : > { %v5685_v56 = vpop.permute.xlu1 %5684 }
 0x850   : > { %5748 = vpow2.f32 %v2277_v55  ;;  %v5687_v58 = vunpack.i.h.bf16 %v5685_v56  ;;  %v5686_v59 = vunpack.i.l.bf16 %v5685_v56 }
 0x851   : > { %5750 = vpow2.f32 %v2275_v54 }
 0x852   : > { %v5383_v60 = vpack.c.bf16 %v5687_v58, %v5686_v59 }
 0x853   : > { %v2745_v61 = vpop.permute.xlu1 %2744 }
 0x854   : > { %5385 = vmatprep.subr.msk.bf16.mxu1 %vm6575_vm3, %v5383_v60  ;;  %5135 = vmatprep.mubr.msk.f32.mxu1 %vm1032_vm2, %v2745_v61 }
 0x855   : > { %5388 = vmatpush3.bf16.xpose.msk.msra.mxu1 %vm6575_vm3, %v5383_v60 }
 0x857   : > { %v2747_v63 = vpop.permute.xlu1 %2746 }
 0x85a   : > { %v5749_v62 = vpop.eup %5748 }
 0x85b   : > { %v2282_v0 = vsel %vm1118_vm4, %v5749_v62, 0.0  ;;  %v5751_v1 = vpop.eup %5750 }
 0x85c   : > { %2283 = vadd.xlane.f32.xlu0 %v2282_v0  ;;  %5136 = vmatmul.mubr.msk.f32.vlgmr.msra.gmra.mrb[16].mxu1 %vm1032_vm2, %v2747_v63  ;;  %v2279_v2 = vsel %vm1118_vm4, %v5751_v1, 0.0 }
 0x860   : > { %2280 = vadd.xlane.f32.xlu0 %v2279_v2 }
 0x876   : > { %5679 = vrot.lane.b32.xlu0 %v6596_v22, %s6096_s21 }
 0x8e9   : > { %v2284_v6 = vpop.xlane.xlu0 %2283 }
 0x8ed   : > { %v2281_v7 = vpop.xlane.xlu0 %2280 }
 0x8ee   : > { %5752 = vrcp.f32 %v2281_v7 }
 0x8ef   : > { %5754 = vrcp.f32 %v2284_v6 }
 0x8f1   : > { %v5680_v9 = vpop.permute.xlu0 %5679 }
 0x8f2   : > { %v5682_v10 = vunpack.i.h.bf16 %v5680_v9  ;;  %v5681_v11 = vunpack.i.l.bf16 %v5680_v9  ;;  %v5118_v12 = vpop.f32.mrb[14].mxu1 }
 0x8f3   : > { %v2551_v13 = vmul.f32 0.35355338, %v5118_v12  ;;  %v2541_v14 = vpop.f32.mrb[15].mxu1 }
 0x8f4   : > { %v5369_v8 = vpack.c.bf16 %v5682_v10, %v5681_v11  ;;  %v2550_v16 = vmul.f32 0.35355338, %v2541_v14 }
 0x8f5   : > { %v2555_v17 = vsel %vm1118_vm4, %v2551_v13, -inf }
 0x8f6   : > { %2556 = vmax.xlane.f32.xlu1 %v2555_v17  ;;  %5370 = vmatprep.subr.bf16.mxu0 %v5369_v8  ;;  %v2552_v18 = vsel %vm1118_vm4, %v2550_v16, -inf }
 0x8f7   : > { %2553 = vmax.xlane.f32.xlu0 %v2552_v18 }
 0x8f8   : > { %v5753_v23 = vpop.eup %5752 }
 0x8f9   : > { %v5755_v27 = vpop.eup %5754  ;;  %v2287_v28 = vmul.f32 %v5753_v23, %v5751_v1 }
 0x8fa   : > { %v2288_v29 = vmul.f32 %v5755_v27, %v5749_v62 }
 0x906   : > { %v5087_v25 = vpop.f32.mrb[8].mxu0 }
 0x907   : > { %v2080_v26 = vpop.f32.mrb[9].mxu0  ;;  %5694 = vrot.lane.b32.xlu1 %v6596_v22, %s6094_s8 }
 0x908   : > { %5090 = vmatprep.mubr.msk.f32.mxu0 %vm1032_vm2, %v2080_v26 }
 0x909   : > { %5091 = vmatmul.mubr.msk.f32.vlgmr.msra.gmra.mrb[2].mxu0 %vm1032_vm2, %v5087_v25 }
 0x90a   : > { %5372 = vmatpush3.bf16.msra.mxu0 %v5369_v8  ;;  %5104 = vmatprep.mubr.msk.f32.mxu0 %vm1118_vm4, %v2287_v28 }
 0x90b   : > { %3029 = vrot.lane.b32.xlu1 %v6592_v21, %s6095_s27  ;;  %5107 = vmatprep.subr.mxu0 %v6639_v24 }
 0x90d   : > { %5105 = vmatmul.mubr.msk.f32.vlgmr.msra.gmra.mrb[10].mxu0 %vm1118_vm4, %v2288_v29 }
 0x90e   : > { %5108 = vmatpush3.msra.mxu0 %v6639_v24 }
 0x90f   : > { %3031 = vrot.lane.b32.xlu1 %v6590_v20, %s6095_s27 }
 0x92f   : > { %v5137_v30 = vpop.f32.mrb[16].mxu1 }
 0x930   : > { %v2836_v31 = vmul.f32 0.35355338, %v5137_v30  ;;  %v2826_v32 = vpop.f32.mrb[17].mxu1 }
 0x931   : > { %v2835_v15 = vmul.f32 0.35355338, %v2826_v32 }
 0x932   : > { %v2840_v33 = vsel %vm1118_vm4, %v2836_v31, -inf }
 0x933   : > { %2841 = vmax.xlane.f32.xlu1 %v2840_v33  ;;  %v2837_v50 = vsel %vm1118_vm4, %v2835_v15, -inf }
 0x983   : > { %v2557_v34 = vpop.xlane.xlu1 %2556 }
 0x984   : > { %v2559_v35 = vsub.f32 %v2551_v13, %v2557_v34  ;;  %v2554_v36 = vpop.xlane.xlu0 %2553 }
 0x985   : > { %v2558_v37 = vsub.f32 %v2550_v16, %v2554_v36 }
 0x986   : > { %v2562_v21 = vmul.f32 1.442695, %v2559_v35 }
 0x987   : > { %v2560_v38 = vmul.f32 1.442695, %v2558_v37  ;;  %v5695_v39 = vpop.permute.xlu1 %5694 }
 0x988   : > { %5756 = vpow2.f32 %v2562_v21  ;;  %v5697_v40 = vunpack.i.h.bf16 %v5695_v39  ;;  %v5696_v41 = vunpack.i.l.bf16 %v5695_v39 }
 0x989   : > { %5758 = vpow2.f32 %v2560_v38 }
 0x98a   : > { %v5393_v24 = vpack.c.bf16 %v5697_v40, %v5696_v41 }
 0x98b   : > { %v3030_v42 = vpop.permute.xlu1 %3029 }
 0x98c   : > { %5395 = vmatprep.subr.msk.bf16.mxu1 %vm6575_vm3, %v5393_v24  ;;  %5154 = vmatprep.mubr.msk.f32.mxu1 %vm1032_vm2, %v3030_v42 }
 0x98d   : > { %5398 = vmatpush3.bf16.xpose.msk.msra.mxu1 %vm6575_vm3, %v5393_v24 }
 0x98f   : > { %v3032_v43 = vpop.permute.xlu1 %3031 }
 0x992   : > { %v5757_v20 = vpop.eup %5756 }
 0x993   : > { %v2567_v44 = vsel %vm1118_vm4, %v5757_v20, 0.0  ;;  %v5759_v45 = vpop.eup %5758 }
 0x994   : > { %5155 = vmatmul.mubr.msk.f32.vlgmr.msra.gmra.mrb[18].mxu1 %vm1032_vm2, %v3032_v43  ;;  %2568 = vadd.xlane.f32.xlu0 %v2567_v44  ;;  %v2564_v46 = vsel %vm1118_vm4, %v5759_v45, 0.0 }
 0x998   : > { %2565 = vadd.xlane.f32.xlu0 %v2564_v46 }
 0x9ae   : > { %5689 = vrot.lane.b32.xlu0 %v6596_v22, %s6097_s13 }
 0x9c0   : > { %v2842_v47 = vpop.xlane.xlu1 %2841 }
 0x9c1   : > { %v2844_v48 = vsub.f32 %v2836_v31, %v2842_v47 }
 0x9c3   : > { %v2847_v49 = vmul.f32 1.442695, %v2844_v48 }
 0x9c5   : > { %5760 = vpow2.f32 %v2847_v49 }
 0x9cd   : > { %2838 = vmax.xlane.f32.xlu0 %v2837_v50 }
 0x9cf   : > { %v6754_v51 = vpop.eup %5760 }
 0x9d0   : > { %v2852_v52 = vsel %vm1118_vm4, %v6754_v51, 0.0 }
 0x9d1   : > { %2853 = vadd.xlane.f32.xlu0 %v2852_v52 }
 0x9dc   : > { %v5092_v54 = vpop.f32.mrb[2].mxu0 }
 0x9dd   : > { %v5487_v55 = vadd.f32 %v5092_v54, %v6760_v53  ;;  %v2161_v56 = vpop.f32.mrb[3].mxu0 }
 0x9de   : > { %v5488_v58 = vadd.f32 %v6760_v53, %v2161_v56 }
 0x9df   : > { %v2173_v59 = vadd.f32 %v5487_v55, %v6532_v5 }
 0x9e0   : > { %v2172_v60 = vadd.f32 %v5488_v58, %v6530_v4  ;;  %v5106_v61 = vpop.f32.mrb[10].mxu0 }
 0x9e1   : > { %2175 = vst.msk [vmem:[#allocation2 + $0x8] sm:$0xff] %vm846_vm1, %v2173_v59  ;;  %v2367_v62 = vpop.f32.mrb[11].mxu0 }
 0x9e2   : > { %2174 = vst.msk [vmem:[#allocation2] sm:$0xff] %vm846_vm1, %v2172_v60  ;;  %5109 = vmatprep.mubr.msk.f32.mxu0 %vm1032_vm2, %v2367_v62 }
 0x9e3   : > { %5110 = vmatmul.mubr.msk.f32.vlgmr.msra.gmra.mrb[12].mxu0 %vm1032_vm2, %v5106_v61 }
 0x9e8   : > { %v6794_v47 = vld [vmem:[#allocation2 + $0x8] sm:$0xff] }
 0x9e9   : > { %v3327_v48 = vsel %vm846_vm1, %v6794_v47, 0.0 }
 0xa21   : > { %v2569_v63 = vpop.xlane.xlu0 %2568 }
 0xa22   : > { %5762 = vrcp.f32 %v2569_v63 }
 0xa25   : > { %v2566_v0 = vpop.xlane.xlu0 %2565 }
 0xa26   : > { %5764 = vrcp.f32 %v2566_v0 }
 0xa29   : > { %v5690_v1 = vpop.permute.xlu0 %5689 }
 0xa2a   : > { %v5692_v2 = vunpack.i.h.bf16 %v5690_v1  ;;  %v5691_v6 = vunpack.i.l.bf16 %v5690_v1 }
 0xa2c   : > { %v5379_v5 = vpack.c.bf16 %v5692_v2, %v5691_v6  ;;  %v5763_v4 = vpop.eup %5762  ;;  %v5796_v2 = vld [vmem:[#allocation2 + $0x18] sm:$0xff] }
 0xa2d   : > { %v2573_v10 = vmul.f32 %v5763_v4, %v5757_v20 }
 0xa2e   : > { %5380 = vmatprep.subr.bf16.mxu0 %v5379_v5 }
 0xa2f   : > { %5382 = vmatpush3.bf16.msra.mxu0 %v5379_v5  ;;  %v5797_v5 = vld [vmem:[#allocation2 + $0x10] sm:$0xff] }
 0xa30   : > { %v5765_v7 = vpop.eup %5764  ;;  %5126 = vmatprep.subr.mxu0 %v6661_v57 }
 0xa31   : > { %v2572_v9 = vmul.f32 %v5765_v7, %v5759_v45 }
 0xa33   : > { %5123 = vmatprep.mubr.msk.f32.mxu0 %vm1118_vm4, %v2572_v9 }
 0xa34   : > { %5124 = vmatmul.mubr.msk.f32.vlgmr.msra.gmra.mrb[14].mxu0 %vm1118_vm4, %v2573_v10 }
 0xa35   : > { %5127 = vmatpush3.msra.mxu0 %v6661_v57  ;;  %v6779_v57 = vld [vmem:[#allocation2] sm:$0xff] }
 0xa36   : > { %v3324_v27 = vsel %vm846_vm1, %v6779_v57, 0.0 }
 0xa5a   : > { %v2839_v11 = vpop.xlane.xlu0 %2838 }
 0xa5b   : > { %v2843_v12 = vsub.f32 %v2835_v15, %v2839_v11 }
 0xa5d   : > { %v2845_v13 = vmul.f32 1.442695, %v2843_v12 }
 0xa5e   : > { %v2854_v28 = vpop.xlane.xlu0 %2853 }
 0xa5f   : > { %5766 = vpow2.f32 %v2845_v13 }
 0xa67   : > { %v5156_v14 = vpop.f32.mrb[18].mxu1 }
 0xa68   : > { %v3111_v8 = vpop.f32.mrb[19].mxu1  ;;  %v3121_v23 = vmul.f32 0.35355338, %v5156_v14 }
 0xa69   : > { %v5767_v16 = vpop.eup %5766  ;;  %v3120_v17 = vmul.f32 0.35355338, %v3111_v8 }
 0xa6a   : > { %v2849_v18 = vsel %vm1118_vm4, %v5767_v16, 0.0  ;;  %v3125_v26 = vsel %vm1118_vm4, %v3121_v23, -inf }
 0xa6b   : > { %2850 = vadd.xlane.f32.xlu0 %v2849_v18  ;;  %v3122_v25 = vsel %vm1118_vm4, %v3120_v17, -inf }
 0xa6c   : > { %3123 = vmax.xlane.f32.xlu1 %v3122_v25  ;;  %v3396_v25 = vld [vmem:[%s6508_s10] sm:$0xff] }
 0xa70   : > { %3126 = vmax.xlane.f32.xlu1 %v3125_v26  ;;  %v3397_v26 = vld [vmem:[%s6508_s10 + $0x8] sm:$0xff] }
 0xa81   : > { %5699 = vrot.lane.b32.xlu0 %v6596_v22, %s6098_s24 }
 0xaa0   : > { %3325 = vadd.xlane.f32.xlu0 %v3324_v27  ;;  %v5403_v27 = vpack.c.bf16 %v3397_v26, %v3396_v25 }
 0xaa2   : > { %5404 = vmatprep.subr.bf16.mxu1 %v5403_v27 }
 0xaa3   : > { %5406 = vmatpush3.bf16.msra.mxu1 %v5403_v27 }
 0xaf8   : > { %v2851_v29 = vpop.xlane.xlu0 %2850 }
 0xaf9   : > { %v3124_v30 = vpop.xlane.xlu1 %3123  ;;  %5768 = vrcp.f32 %v2851_v29  ;;  %v3399_v29 = vld [vmem:[%s6508_s10 + $0x18] sm:$0xff] }
 0xafa   : > { %v3128_v31 = vsub.f32 %v3120_v17, %v3124_v30  ;;  %5770 = vrcp.f32 %v2854_v28  ;;  %v3398_v28 = vld [vmem:[%s6508_s10 + $0x10] sm:$0xff] }
 0xafb   : > { %v5407_v30 = vpack.c.bf16 %v3399_v29, %v3398_v28 }
 0xafc   : > { %v5700_v32 = vpop.permute.xlu0 %5699  ;;  %v3130_v21 = vmul.f32 1.442695, %v3128_v31 }
 0xafd   : > { %v5702_v33 = vunpack.i.h.bf16 %v5700_v32  ;;  %v5701_v34 = vunpack.i.l.bf16 %v5700_v32  ;;  %v3127_v35 = vpop.xlane.xlu1 %3126  ;;  %5408 = vmatprep.subr.bf16.mxu1 %v5407_v30 }
 0xafe   : > { %v3129_v36 = vsub.f32 %v3121_v23, %v3127_v35  ;;  %5410 = vmatpush3.bf16.msra.mxu1 %v5407_v30 }
 0xaff   : > { %v5389_v37 = vpack.c.bf16 %v5702_v33, %v5701_v34 }
 0xb00   : > { %v3132_v38 = vmul.f32 1.442695, %v3129_v36 }
 0xb01   : > { %5390 = vmatprep.subr.bf16.mxu0 %v5389_v37 }
 0xb02   : > { %5772 = vpow2.f32 %v3132_v38 }
 0xb03   : > { %5774 = vpow2.f32 %v3130_v21  ;;  %v5769_v39 = vpop.eup %5768 }
 0xb04   : > { %v5771_v24 = vpop.eup %5770  ;;  %v2857_v42 = vmul.f32 %v5769_v39, %v5767_v16 }
 0xb05   : > { %v2858_v43 = vmul.f32 %v5771_v24, %v6754_v51 }
 0xb07   : > { %v5125_v40 = vpop.f32.mrb[14].mxu0 }
 0xb08   : > { %v2652_v41 = vpop.f32.mrb[15].mxu0 }
 0xb09   : > { %5128 = vmatprep.mubr.msk.f32.mxu0 %vm1032_vm2, %v2652_v41 }
 0xb0a   : > { %5129 = vmatmul.mubr.msk.f32.vlgmr.msra.gmra.mrb[12].mxu0 %vm1032_vm2, %v5125_v40 }
 0xb0b   : > { %5392 = vmatpush3.bf16.msra.mxu0 %v5389_v37  ;;  %5142 = vmatprep.mubr.msk.f32.mxu0 %vm1118_vm4, %v2857_v42 }
 0xb0c   : > { %v5773_v20 = vpop.eup %5772  ;;  %5145 = vmatprep.subr.mxu0 %v6680_v19 }
 0xb0d   : > { %v3137_v44 = vsel %vm1118_vm4, %v5773_v20, 0.0  ;;  %v5775_v45 = vpop.eup %5774 }
 0xb0e   : > { %3138 = vadd.xlane.f32.xlu1 %v3137_v44  ;;  %5143 = vmatmul.mubr.msk.f32.vlgmr.msra.gmra.mrb[16].mxu0 %vm1118_vm4, %v2858_v43  ;;  %v3134_v46 = vsel %vm1118_vm4, %v5775_v45, 0.0 }
 0xb0f   : > { %5146 = vmatpush3.msra.mxu0 %v6680_v19 }
 0xb12   : > { %3135 = vadd.xlane.f32.xlu1 %v3134_v46 }
 0xb23   : > { %5704 = vrot.lane.b32.xlu1 %v6596_v22, %s6099_s22 }
 0xb47   : > { %3328 = vadd.xlane.f32.xlu1 %v3327_v48  ;;  %v4783_v48 = vld [vmem:[%s816_s9] ss:$0 sm:$0xff]  ;;  %s7155_s9 = scalar_lea.vmem [#allocation8], %s6451_s30 }
 0xb9b   : > { %v3139_v49 = vpop.xlane.xlu1 %3138 }
 0xb9f   : > { %v3136_v15 = vpop.xlane.xlu1 %3135 }
 0xba0   : > { %5776 = vrcp.f32 %v3136_v15 }
 0xba1   : > { %5778 = vrcp.f32 %v3139_v49 }
 0xba3   : > { %v5705_v50 = vpop.permute.xlu1 %5704 }
 0xba4   : > { %v5707_v51 = vunpack.i.h.bf16 %v5705_v50  ;;  %v5706_v52 = vunpack.i.l.bf16 %v5705_v50 }
 0xba6   : > { %v5399_v54 = vpack.c.bf16 %v5707_v51, %v5706_v52 }
 0xba8   : > { %5400 = vmatprep.subr.bf16.mxu0 %v5399_v54 }
 0xbaa   : > { %v5777_v19 = vpop.eup %5776 }
 0xbab   : > { %v5779_v58 = vpop.eup %5778  ;;  %v3142_v22 = vmul.f32 %v5777_v19, %v5775_v45  ;;  %v4782_v45 = vld [vmem:[%s7153_s19] ss:$0 sm:$0xff] }
 0xbac   : > { %v3143_v59 = vmul.f32 %v5779_v58, %v5773_v20  ;;  %v3524_v19 = vld [vmem:[%s6514_s18] sm:$0xff]  ;;  %v3526_v58 = vld [vmem:[%s6514_s18 + $0x10] sm:$0xff] }
 0xbd4   : > { %v3329_v9 = vpop.xlane.xlu1 %3328 }
 0xbd5   : > { %v3337_v12 = vmul.f32 0.03125, %v3329_v9 }
 0xbd7   : > { %v3341_v14 = vsub.f32 %v6794_v47, %v3337_v12 }
 0xbd9   : > { %v3345_v18 = vmul.f32 %v3341_v14, %v3341_v14 }
 0xbdb   : > { %v3351_v23 = vsel %vm846_vm1, %v3345_v18, 0.0  ;;  %v4784_v18 = vld [vmem:[%s7154_s0] ss:$0 sm:$0xff] }
 0xbe1   : > { %v5144_v55 = vpop.f32.mrb[16].mxu0 }
 0xbe2   : > { %v2937_v56 = vpop.f32.mrb[17].mxu0 }
 0xbe3   : > { %5147 = vmatprep.mubr.msk.f32.mxu0 %vm1032_vm2, %v2937_v56 }
 0xbe4   : > { %5148 = vmatmul.mubr.msk.f32.vlgmr.msra.gmra.mrb[12].mxu0 %vm1032_vm2, %v5144_v55  ;;  %v3525_v55 = vld [vmem:[%s6514_s18 + $0x8] sm:$0xff] }
 0xbe5   : > { %5402 = vmatpush3.bf16.msra.mxu0 %v5399_v54  ;;  %5161 = vmatprep.mubr.msk.f32.mxu0 %vm1118_vm4, %v3142_v22  ;;  %v5411_v56 = vpack.c.bf16 %v3525_v55, %v3524_v19  ;;  %v3527_v22 = vld [vmem:[%s6514_s18 + $0x18] sm:$0xff] }
 0xbe6   : > { %5164 = vmatprep.subr.mxu0 %v6722_v3 }
 0xbe8   : > { %5162 = vmatmul.mubr.msk.f32.vlgmr.msra.gmra.mrb[18].mxu0 %vm1118_vm4, %v3143_v59  ;;  %v5415_v59 = vpack.c.bf16 %v3527_v22, %v3526_v58 }
 0xbe9   : > { %5165 = vmatpush3.msra.mxu0 %v6722_v3  ;;  %v3326_v3 = vpop.xlane.xlu0 %3325 }
 0xbea   : > { %v3336_v7 = vmul.f32 0.03125, %v3326_v3  ;;  %5412 = vmatprep.subr.bf16.mxu0 %v5411_v56 }
 0xbec   : > { %v3340_v11 = vsub.f32 %v6779_v57, %v3336_v7 }
 0xbee   : > { %v3344_v16 = vmul.f32 %v3340_v11, %v3340_v11 }
 0xbf0   : > { %v3348_v17 = vsel %vm846_vm1, %v3344_v16, 0.0 }
 0xcbb   : > { %v5163_v60 = vpop.f32.mrb[18].mxu0 }
 0xcbc   : > { %v3222_v61 = vpop.f32.mrb[19].mxu0 }
 0xcbd   : > { %5166 = vmatprep.mubr.msk.f32.mxu0 %vm1032_vm2, %v3222_v61  ;;  %v3529_v61 = vld [vmem:[%s6514_s18 + $0x28] sm:$0xff] }
 0xcbe   : > { %5167 = vmatmul.mubr.msk.f32.vlgmr.msra.gmra.mrb[12].mxu0 %vm1032_vm2, %v5163_v60  ;;  %v3528_v60 = vld [vmem:[%s6514_s18 + $0x20] sm:$0xff] }
 0xcbf   : > { %5414 = vmatpush3.bf16.msra.mxu0 %v5411_v56 }
 0xcc0   : > { %5416 = vmatprep.subr.bf16.mxu0 %v5415_v59 }
 0xcc3   : > { %5418 = vmatpush3.bf16.msra.mxu0 %v5415_v59 }
 0xd91   : > { %v5168_v62 = vpop.f32.mrb[12].mxu0 }
 0xd92   : > { %v5489_v63 = vadd.f32 %v5168_v62, %v6760_v53  ;;  %v3303_v0 = vpop.f32.mrb[13].mxu0  ;;  %v5419_v62 = vpack.c.bf16 %v3529_v61, %v3528_v60 }
 0xd93   : > { %v5490_v1 = vadd.f32 %v6760_v53, %v3303_v0  ;;  %v3531_v0 = vld [vmem:[%s6514_s18 + $0x38] sm:$0xff] }
 0xd94   : > { %v3315_v6 = vadd.f32 %v5796_v2, %v5489_v63  ;;  %5420 = vmatprep.subr.bf16.mxu0 %v5419_v62  ;;  %v3530_v63 = vld [vmem:[%s6514_s18 + $0x30] sm:$0xff] }
 0xd95   : > { %v3314_v4 = vadd.f32 %v5797_v5, %v5490_v1  ;;  %5422 = vmatpush3.bf16.msra.mxu0 %v5419_v62  ;;  %v5423_v1 = vpack.c.bf16 %v3531_v0, %v3530_v63  ;;  %v3653_v63 = vld [vmem:[%s7156_s26 + $0x18] sm:$0xff] (!%p4794_p8)  ;;  %v6102_v0 = vmov (!%p4794_p8), 0.0  }
 0xd96   : > { %3317 = vst.msk [vmem:[#allocation2 + $0x18] sm:$0xff] %vm846_vm1, %v3315_v6 }
 0xd97   : > { %3316 = vst.msk [vmem:[#allocation2 + $0x10] sm:$0xff] %vm846_vm1, %v3314_v4  ;;  %5424 = vmatprep.subr.bf16.mxu0 %v5423_v1 }
 0xd99   : > { %5426 = vmatpush3.bf16.msra.mxu0 %v5423_v1 }
 0xd9d   : > { %v6815_v13 = vld [vmem:[#allocation2 + $0x18] sm:$0xff] }
 0xd9e   : > { %v6810_v10 = vld [vmem:[#allocation2 + $0x10] sm:$0xff]  ;;  %v3333_v8 = vsel %vm846_vm1, %v6815_v13, 0.0 }
 0xd9f   : > { %v3330_v53 = vsel %vm846_vm1, %v6810_v10, 0.0 }
 0xda0   : > { %3331 = vadd.xlane.f32.xlu0 %v3330_v53 }
 0xda4   : > { %3334 = vadd.xlane.f32.xlu0 %v3333_v8 }
 0xda8   : > { %3349 = vadd.xlane.f32.xlu0 %v3348_v17 }
 0xdac   : > { %3352 = vadd.xlane.f32.xlu0 %v3351_v23 }
 0xe2d   : > { %v3332_v31 = vpop.xlane.xlu0 %3331 }
 0xe2e   : > { %v3338_v32 = vmul.f32 0.03125, %v3332_v31 }
 0xe30   : > { %v3342_v33 = vsub.f32 %v6810_v10, %v3338_v32 }
 0xe31   : > { %v3335_v34 = vpop.xlane.xlu0 %3334 }
 0xe32   : > { %v3339_v35 = vmul.f32 0.03125, %v3335_v34  ;;  %v3346_v36 = vmul.f32 %v3342_v33, %v3342_v33 }
 0xe34   : > { %v3343_v37 = vsub.f32 %v6815_v13, %v3339_v35  ;;  %v3354_v21 = vsel %vm846_vm1, %v3346_v36, 0.0 }
 0xe35   : > { %3355 = vadd.xlane.f32.xlu0 %v3354_v21  ;;  %v3350_v38 = vpop.xlane.xlu0 %3349 }
 0xe36   : > { %v3360_v39 = vmul.f32 0.03125, %v3350_v38  ;;  %v3347_v40 = vmul.f32 %v3343_v37, %v3343_v37 }
 0xe38   : > { %v3364_v41 = vadd.f32 1e-05, %v3360_v39  ;;  %v3357_v24 = vsel %vm846_vm1, %v3347_v40, 0.0 }
 0xe39   : > { %3358 = vadd.xlane.f32.xlu1 %v3357_v24  ;;  %v3353_v42 = vpop.xlane.xlu0 %3352 }
 0xe3a   : > { %5780 = vrsqrt.f32 %v3364_v41  ;;  %v3361_v20 = vmul.f32 0.03125, %v3353_v42 }
 0xe3c   : > { %v3365_v43 = vadd.f32 1e-05, %v3361_v20 }
 0xe3e   : > { %5782 = vrsqrt.f32 %v3365_v43 }
 0xe44   : > { %v5781_v44 = vpop.eup %5780 }
 0xe45   : > { %v3372_v46 = vmul.f32 %v5781_v44, %v3340_v11 }
 0xe47   : > { %v3382_v49 = vmul.f32 %v4782_v45, %v3372_v46 }
 0xe48   : > { %v5783_v15 = vpop.eup %5782 }
 0xe49   : > { %v3373_v50 = vmul.f32 %v5783_v15, %v3341_v14  ;;  %v3392_v51 = vadd.f32 %v4783_v48, %v3382_v49  ;;  %v4789_v15 = vld [vmem:[%s7155_s9] ss:$0 sm:$0xff] }
 0xe4b   : > { %5177 = vmatprep.mubr.msk.f32.mxu1 %vm846_vm1, %v3392_v51  ;;  %v3383_v52 = vmul.f32 %v4782_v45, %v3373_v50 }
 0xe4d   : > { %v3393_v54 = vadd.f32 %v4783_v48, %v3383_v52 }
 0xe4f   : > { %5178 = vmatmul.mubr.msk.f32.vlgmr.msra.gmra.mrb[20].mxu1 %vm846_vm1, %v3393_v54 }
 0xec2   : > { %v3356_v2 = vpop.xlane.xlu0 %3355 }
 0xec3   : > { %v3362_v6 = vmul.f32 0.03125, %v3356_v2  ;;  %v4796_v2 = vld [vmem:[%s7156_s26 + $0x20] sm:$0xff] (!%p4794_p8) }
 0xec5   : > { %v3366_v5 = vadd.f32 1e-05, %v3362_v6  ;;  %v4797_v6 = vld [vmem:[%s7156_s26 + $0x28] sm:$0xff] (!%p4794_p8) }
 0xec6   : > { %v3359_v4 = vpop.xlane.xlu1 %3358 }
 0xec7   : > { %5784 = vrsqrt.f32 %v3366_v5  ;;  %v3363_v3 = vmul.f32 0.03125, %v3359_v4  ;;  %v6906_v5 = vpack.c.bf16 (!%p4794_p8), %v4797_v6, %v4796_v2  ;;  %v4798_v4 = vld [vmem:[%s7156_s26 + $0x30] sm:$0xff] (!%p4794_p8) }
 0xec9   : > { %v3367_v7 = vadd.f32 1e-05, %v3363_v3  ;;  %v4799_v3 = vld [vmem:[%s7156_s26 + $0x38] sm:$0xff] (!%p4794_p8) }
 0xecb   : > { %5786 = vrsqrt.f32 %v3367_v7  ;;  %v6918_v7 = vpack.c.bf16 (!%p4794_p8), %v4799_v3, %v4798_v4 }
 0xed1   : > { %v5785_v9 = vpop.eup %5784 }
 0xed2   : > { %v3374_v11 = vmul.f32 %v5785_v9, %v3342_v33  ;;  %v4801_v9 = vld [vmem:[%s7156_s26 + $0x40] sm:$0xff] (!%p4794_p8) }
 0xed4   : > { %v3384_v12 = vmul.f32 %v4782_v45, %v3374_v11  ;;  %v4802_v11 = vld [vmem:[%s7156_s26 + $0x48] sm:$0xff] (!%p4794_p8) }
 0xed5   : > { %v5787_v53 = vpop.eup %5786 }
 0xed6   : > { %v3394_v14 = vadd.f32 %v4783_v48, %v3384_v12  ;;  %v3375_v8 = vmul.f32 %v5787_v53, %v3343_v37  ;;  %v6931_v53 = vpack.c.bf16 (!%p4794_p8), %v4802_v11, %v4801_v9  ;;  %v4379_v11 = vld [vmem:[#allocation12] sm:$0x1] (!%p4794_p8) }
 0xed8   : > { %5180 = vmatprep.mubr.msk.f32.mxu1 %vm846_vm1, %v3394_v14  ;;  %v3385_v16 = vmul.f32 %v4782_v45, %v3375_v8  ;;  %v4803_v14 = vld [vmem:[%s7156_s26 + $0x50] sm:$0xff] (!%p4794_p8)  ;;  %v4804_v8 = vld [vmem:[%s7156_s26 + $0x58] sm:$0xff] (!%p4794_p8) }
 0xeda   : > { %v3395_v17 = vadd.f32 %v4783_v48, %v3385_v16  ;;  %v6942_v16 = vpack.c.bf16 (!%p4794_p8), %v4804_v8, %v4803_v14  ;;  %v4399_v14 = vld [vmem:[#allocation14] sm:$0x1] (!%p4794_p8) }
 0xedc   : > { %5181 = vmatmul.mubr.msk.f32.gmra.mrb[22].mxu1 %vm846_vm1, %v3395_v17  ;;  %v4806_v17 = vld [vmem:[%s7156_s26 + $0x60] sm:$0xff] (!%p4794_p8) }
 0xedd   : > { %5257 = vmatprep.mubr.msk.f32.mxu1 (!%p4794_p8), %vm6101_vm6, %v6102_v0 }
 0xf22   : > { %v5179_v23 = vpop.f32.mrb[20].mxu1 }
 0xf23   : > { %v3491_v25 = vadd.f32 %v5179_v23, %v4784_v18  ;;  %v3485_v26 = vpop.f32.mrb[21].mxu1 }
 0xf24   : > { %v3486_v27 = vadd.f32 %v4784_v18, %v3485_v26  ;;  %v4808_v26 = vld [vmem:[%s7156_s26 + $0x70] sm:$0xff] (!%p4794_p8) }
 0xf25   : > { %v3509_v28 = vmul.f32 0.70710677, %v3491_v25  ;;  %v3505_v35 = vmul.f32 0.5, %v3491_v25 }
 0xf26   : > { %v3508_v29 = vmul.f32 0.70710677, %v3486_v27  ;;  %v3504_v33 = vmul.f32 0.5, %v3486_v27  ;;  %v4809_v27 = vld [vmem:[%s7156_s26 + $0x78] sm:$0xff] (!%p4794_p8) }
 0xf27   : > { %5788 = verf.f32 %v3509_v28  ;;  %v6966_v28 = vpack.c.bf16 (!%p4794_p8), %v4809_v27, %v4808_v26 }
 0xf28   : > { %5790 = verf.f32 %v3508_v29 }
 0xf31   : > { %v5789_v30 = vpop.eup %5788 }
 0xf32   : > { %v5791_v31 = vpop.eup %5790  ;;  %v3517_v32 = vadd.f32 1.0, %v5789_v30  ;;  %v3649_v30 = vld [vmem:[#allocation9] sm:$0x1] (!%p4794_p8) }
 0xf33   : > { %v3516_v34 = vadd.f32 1.0, %v5791_v31 }
 0xf34   : > { %v3521_v37 = vmul.f32 %v3517_v32, %v3505_v35 }
 0xf35   : > { %v3520_v36 = vmul.f32 %v3516_v34, %v3504_v33 }
 0xf37   : > { %5199 = vmatprep.mubr.msk.f32.mxu0 %vm3539_vm5, %v3520_v36 }
 0xf38   : > { %5200 = vmatmul.mubr.msk.f32.vlgmr.msra.gmra.mrb[20].mxu0 %vm3539_vm5, %v3521_v37 }
 0xfaf   : > { %v5182_v21 = vpop.f32.mrb[22].mxu1 }
 0xfb0   : > { %v3501_v38 = vadd.f32 %v5182_v21, %v4784_v18  ;;  %v3495_v39 = vpop.f32.mrb[23].mxu1 }
 0xfb1   : > { %v3496_v40 = vadd.f32 %v4784_v18, %v3495_v39  ;;  %v4807_v18 = vld [vmem:[%s7156_s26 + $0x68] sm:$0xff] (!%p4794_p8) }
 0xfb2   : > { %v3511_v41 = vmul.f32 0.70710677, %v3501_v38  ;;  %v3507_v46 = vmul.f32 0.5, %v3501_v38  ;;  %v6955_v25 = vpack.c.bf16 (!%p4794_p8), %v4807_v18, %v4806_v17 }
 0xfb3   : > { %v3510_v24 = vmul.f32 0.70710677, %v3496_v40  ;;  %v3506_v44 = vmul.f32 0.5, %v3496_v40  ;;  %v3984_v40 = vld [vmem:[%s7157_s23] sm:$0xff] (!%p4794_p8) }
 0xfb4   : > { %5792 = verf.f32 %v3511_v41  ;;  %v3985_v41 = vld [vmem:[%s7157_s23 + $0x8] sm:$0xff] (!%p4794_p8) }
 0xfb5   : > { %5794 = verf.f32 %v3510_v24  ;;  %v3986_v24 = vld [vmem:[%s7157_s23 + $0x10] sm:$0xff] (!%p4794_p8) }
 0xfbe   : > { %v5793_v42 = vpop.eup %5792 }
 0xfbf   : > { %v5795_v20 = vpop.eup %5794  ;;  %v3519_v43 = vadd.f32 1.0, %v5793_v42  ;;  %v5452_v42 = vpack.c.bf16 (!%p4794_p8), %v3985_v41, %v3984_v40 }
 0xfc0   : > { %v3518_v45 = vadd.f32 1.0, %v5795_v20  ;;  %v3987_v20 = vld [vmem:[%s7157_s23 + $0x18] sm:$0xff] (!%p4794_p8) }
 0xfc1   : > { %v3523_v49 = vmul.f32 %v3519_v43, %v3507_v46  ;;  %v5455_v43 = vpack.c.bf16 (!%p4794_p8), %v3987_v20, %v3986_v24 }
 0xfc2   : > { %v3522_v48 = vmul.f32 %v3518_v45, %v3506_v44 }
 0xfc4   : > { %5202 = vmatprep.mubr.msk.f32.mxu0 %vm3539_vm5, %v3522_v48 }
 0xfc5   : > { %5203 = vmatmul.mubr.msk.f32.gmra.mrb[22].mxu0 %vm3539_vm5, %v3523_v49  ;;  %v3966_v49 = vld [vmem:[#allocation11] sm:$0x1] (!%p4794_p8) }
 0xfc6   : > { %5213 = vmatprep.mubr.msk.f32.mxu0 (!%p4794_p8), %vm6101_vm6, %v6102_v0 }
0x100b   : > { %v5201_v50 = vpop.f32.mrb[20].mxu0 }
0x100c   : > { %v3624_v51 = vadd.f32 %v5201_v50, %v4789_v15  ;;  %v3618_v52 = vpop.f32.mrb[21].mxu0  ;;  %v3967_v50 = vld [vmem:[#allocation12] sm:$0x1] (!%p4794_p8) }
0x100d   : > { %v3619_v54 = vadd.f32 %v4789_v15, %v3618_v52 }
0x100e   : > { %v3638_v19 = vadd.f32 %v3624_v51, %v6794_v47  ;;  %v3651_v47 = vld [vmem:[%s7156_s26 + $0x8] sm:$0xff] (!%p4794_p8) }
0x100f   : > { %v6862_v55 = vadd.f32 %v3619_v54, %v6779_v57  ;;  %v3650_v57 = vld [vmem:[%s7156_s26] sm:$0xff] (!%p4794_p8) }
0x1010   : > { %3642 = vst.msk [vmem:[#allocation2 + $0x8] sm:$0xff] %vm846_vm1, %v3638_v19  ;;  %v6885_v62 = vpack.c.bf16 (!%p4794_p8), %v3651_v47, %v3650_v57 }
0x1011   : > { %3641 = vst.msk [vmem:[#allocation2] sm:$0xff] %vm846_vm1, %v6862_v55  ;;  %v3733_v12 = vrot.slane (!%p4794_p8), %v6862_v55, 1  ;;  %v3812_v23 = vrot.slane (!%p4794_p8), %v6862_v55, 2  ;;  %v3891_v29 = vrot.slane (!%p4794_p8), %v6862_v55, 3 }
0x1098   : > { %v5204_v56 = vpop.f32.mrb[22].mxu0  ;;  %3648 = sbr.rel (%p4794_p8) target bundleno = 5589 (0x15d5), region = 128 }
0x1099   : > { %v3634_v58 = vadd.f32 %v5204_v56, %v4789_v15  ;;  %v3628_v22 = vpop.f32.mrb[23].mxu0  ;;  %v3988_v56 = vld [vmem:[#allocation14] sm:$0x1] (!%p4794_p8) }
0x109a   : > { %v3629_v59 = vadd.f32 %v4789_v15, %v3628_v22 }
0x109b   : > { %v3640_v60 = vadd.f32 %v3634_v58, %v6815_v13  ;;  %v6100_v13 = vmov (!%p4794_p8), 0.0|0.0  }
0x109c   : > { %v6869_v61 = vadd.f32 %v3629_v59, %v6810_v10  ;;  %v3652_v10 = vld [vmem:[%s7156_s26 + $0x10] sm:$0xff] (!%p4794_p8)  ;;  %5427 = vmatprep.subr.bf16.mxu0 (!%p4794_p8), %v6100_v13  ;;  %5451 = vmatprep.subr.bf16.mxu1 (!%p4794_p8), %v6100_v13 }
0x109d   : > { %3644 = vst.msk [vmem:[#allocation2 + $0x18] sm:$0xff] %vm846_vm1, %v3640_v60  ;;  %5429 = vmatpush3.bf16.msra.mxu0 (!%p4794_p8), %v6885_v62  ;;  %v6896_v1 = vpack.c.bf16 (!%p4794_p8), %v3653_v63, %v3652_v10  ;;  %5453 = vmatpush3.bf16.msra.mxu1 (!%p4794_p8), %v5452_v42  ;;  %v4064_v60 = vld [vmem:[#allocation9] sm:$0x1] (!%p4794_p8) }
0x109e   : > { %3643 = vst.msk [vmem:[#allocation2 + $0x10] sm:$0xff] %vm846_vm1, %v6869_v61  ;;  %5430 = vmatprep.subr.bf16.mxu0 (!%p4794_p8), %v6100_v13  ;;  %5454 = vmatprep.subr.bf16.mxu1 (!%p4794_p8), %v6100_v13  ;;  %v4147_v54 = vrot.slane (!%p4794_p8), %v6869_v61, 1  ;;  %v4225_v19 = vrot.slane (!%p4794_p8), %v6869_v61, 2 }
0x10a1   : > { %5432 = vmatpush3.bf16.msra.mxu0 %v6896_v1  ;;  %5456 = vmatpush3.bf16.msra.mxu1 %v5455_v43 }
0x10a2   : > { %5433 = vmatprep.subr.bf16.mxu0 %v6100_v13  ;;  %5457 = vmatprep.subr.bf16.mxu1 %v6100_v13 }
0x10a4   : > { %5214 = vmatmul.mubr.msk.f32.vlgmr.msra.gmra.mrb[0].mxu0 %vm846_vm1, %v6862_v55  ;;  %v4303_v55 = vrot.slane %v6869_v61, 3 }
0x10a5   : > { %5435 = vmatpush3.bf16.msra.mxu0 %v6906_v5  ;;  %5224 = vmatprep.mubr.msk.f32.mxu0 %vm6101_vm6, %v6102_v0 }
0x10a6   : > { %5436 = vmatprep.subr.bf16.mxu0 %v6100_v13 }
0x10a9   : > { %5438 = vmatpush3.bf16.msra.mxu0 %v6918_v7 }
0x10aa   : > { %5439 = vmatprep.subr.bf16.mxu0 %v6100_v13 }
0x10ac   : > { %5225 = vmatmul.mubr.msk.f32.vlgmr.msra.gmra.mrb[0].mxu0 %vm846_vm1, %v3733_v12 }
0x10ad   : > { %5441 = vmatpush3.bf16.msra.mxu0 %v6931_v53  ;;  %5235 = vmatprep.mubr.msk.f32.mxu0 %vm6101_vm6, %v6102_v0 }
0x10ae   : > { %5442 = vmatprep.subr.bf16.mxu0 %v6100_v13 }
0x10b1   : > { %5444 = vmatpush3.bf16.msra.mxu0 %v6942_v16 }
0x10b2   : > { %5445 = vmatprep.subr.bf16.mxu0 %v6100_v13 }
0x10b4   : > { %5236 = vmatmul.mubr.msk.f32.vlgmr.msra.gmra.mrb[0].mxu0 %vm846_vm1, %v3812_v23 }
0x10b5   : > { %5447 = vmatpush3.bf16.msra.mxu0 %v6955_v25  ;;  %5246 = vmatprep.mubr.msk.f32.mxu0 %vm6101_vm6, %v6102_v0 }
0x10b6   : > { %5448 = vmatprep.subr.bf16.mxu0 %v6100_v13 }
0x10b9   : > { %5450 = vmatpush3.bf16.msra.mxu0 %v6966_v28 }
0x10ba   : > { %5481 = vmatprep.subr.bf16.mxu0 %v6100_v13 }
0x10bc   : > { %5247 = vmatmul.mubr.msk.f32.vlgmr.msra.gmra.mrb[0].mxu0 %vm846_vm1, %v3891_v29 }
0x10bd   : > { %5312 = vmatprep.mubr.msk.f32.mxu0 %vm6101_vm6, %v6102_v0  ;;  %5483 = vmatpush3.bf16.msra.mxu0 %v5452_v42 }
0x10be   : > { %5484 = vmatprep.subr.bf16.mxu0 %v6100_v13 }
0x10c1   : > { %5486 = vmatpush3.bf16.msra.mxu0 %v5455_v43 }
0x118f   : > { %v3960_v31 = vpop.f32.mrb[0].mxu0 }
0x1190   : > { %v5503_v32 = vadd.f32 %v3960_v31, %v3649_v30  ;;  %v5248_v33 = vpop.f32.mrb[1].mxu0 }
0x1192   : > { %v3965_v34 = vmax.f32 %v5503_v32, 0.0 }
0x1194   : > { %v3969_v35 = vsel %vm3968_vm7, %v3965_v34, 0.0 }
0x1195   : > { %3970 = vadd.xlane.f32.xlu0 %v3969_v35 }
0x1222   : > { %v3971_v36 = vpop.xlane.xlu0 %3970 }
0x1223   : > { %v3972_v37 = vmul.f32 0.03125, %v3971_v36 }
0x1225   : > { %v3973_v21 = vsub.f32 %v3965_v34, %v3972_v37 }
0x1227   : > { %v3974_v38 = vmul.f32 %v3973_v21, %v3973_v21 }
0x1229   : > { %v3975_v39 = vsel %vm3968_vm7, %v3974_v38, 0.0 }
0x122a   : > { %3976 = vadd.xlane.f32.xlu0 %v3975_v39 }
0x12b7   : > { %v3977_v44 = vpop.xlane.xlu0 %3976 }
0x12b8   : > { %v3978_v45 = vmul.f32 0.03125, %v3977_v44 }
0x12ba   : > { %v3979_v46 = vadd.f32 1e-05, %v3978_v45 }
0x12bc   : > { %5798 = vrsqrt.f32 %v3979_v46 }
0x12c6   : > { %v5799_v48 = vpop.eup %5798 }
0x12c7   : > { %v3981_v15 = vmul.f32 %v5799_v48, %v3973_v21 }
0x12c9   : > { %v3982_v51 = vmul.f32 %v3981_v15, %v3966_v49 }
0x12cb   : > { %v3983_v52 = vadd.f32 %v3982_v51, %v3967_v50 }
0x12cd   : > { %5258 = vmatmul.mubr.msk.f32.vlgmr.msra.gmra.mrb[0].mxu1 %vm846_vm1, %v3983_v52 }
0x12ce   : > { %5459 = vmatpush3.bf16.msra.mxu1 %v6885_v62  ;;  %5268 = vmatprep.mubr.msk.f32.mxu1 %vm6101_vm6, %v6102_v0 }
0x12cf   : > { %5460 = vmatprep.subr.bf16.mxu1 %v6100_v13 }
0x12d2   : > { %5462 = vmatpush3.bf16.msra.mxu1 %v6896_v1 }
0x12d3   : > { %5463 = vmatprep.subr.bf16.mxu1 %v6100_v13 }
0x12d5   : > { %5269 = vmatmul.mubr.msk.f32.vlgmr.msra.gmra.mrb[2].mxu1 %vm846_vm1, %v6869_v61 }
0x12d6   : > { %5465 = vmatpush3.bf16.msra.mxu1 %v6906_v5  ;;  %5279 = vmatprep.mubr.msk.f32.mxu1 %vm6101_vm6, %v6102_v0 }
0x12d7   : > { %5466 = vmatprep.subr.bf16.mxu1 %v6100_v13 }
0x12da   : > { %5468 = vmatpush3.bf16.msra.mxu1 %v6918_v7  ;;  %v4378_v7 = vld [vmem:[#allocation11] sm:$0x1] }
0x12db   : > { %5469 = vmatprep.subr.bf16.mxu1 %v6100_v13 }
0x12dd   : > { %5280 = vmatmul.mubr.msk.f32.vlgmr.msra.gmra.mrb[2].mxu1 %vm846_vm1, %v4147_v54 }
0x12de   : > { %5471 = vmatpush3.bf16.msra.mxu1 %v6931_v53  ;;  %5290 = vmatprep.mubr.msk.f32.mxu1 %vm6101_vm6, %v6102_v0 }
0x12df   : > { %5472 = vmatprep.subr.bf16.mxu1 %v6100_v13 }
0x12e2   : > { %5474 = vmatpush3.bf16.msra.mxu1 %v6942_v16 }
0x12e3   : > { %5475 = vmatprep.subr.bf16.mxu1 %v6100_v13 }
0x12e5   : > { %5291 = vmatmul.mubr.msk.f32.vlgmr.msra.gmra.mrb[2].mxu1 %vm846_vm1, %v4225_v19 }
0x12e6   : > { %5477 = vmatpush3.bf16.msra.mxu1 %v6955_v25  ;;  %5301 = vmatprep.mubr.msk.f32.mxu1 %vm6101_vm6, %v6102_v0 }
0x12e7   : > { %5478 = vmatprep.subr.bf16.mxu1 %v6100_v13 }
0x12ea   : > { %5480 = vmatpush3.bf16.msra.mxu1 %v6966_v28 }
0x12ed   : > { %5302 = vmatmul.mubr.msk.f32.vlgmr.msra.gmra.mrb[2].mxu1 %vm846_vm1, %v4303_v55 }
0x13a0   : > { %v4058_v58 = vpop.f32.mrb[0].mxu1 }
0x13a1   : > { %v4059_v22 = vadd.f32 %v4058_v58, %v3988_v56  ;;  %v5259_v59 = vpop.f32.mrb[1].mxu1 }
0x13a3   : > { %4063 = vst.msk [vmem:[#allocation15] sm:$0x1] %vm4062_vm8, %v4059_v22 }
0x13c0   : > { %v4372_v57 = vpop.f32.mrb[2].mxu1 }
0x13c1   : > { %v5504_v47 = vadd.f32 %v4372_v57, %v4064_v60  ;;  %v5303_v10 = vpop.f32.mrb[3].mxu1 }
0x13c3   : > { %v4377_v62 = vmax.f32 %v5504_v47, 0.0 }
0x13c5   : > { %v4380_v13 = vsel %vm3968_vm7, %v4377_v62, 0.0 }
0x13c6   : > { %4381 = vadd.xlane.f32.xlu1 %v4380_v13 }
0x1453   : > { %v4382_v61 = vpop.xlane.xlu1 %4381 }
0x1454   : > { %v4383_v63 = vmul.f32 0.03125, %v4382_v61 }
0x1456   : > { %v4384_v0 = vsub.f32 %v4377_v62, %v4383_v63 }
0x1458   : > { %v4385_v1 = vmul.f32 %v4384_v0, %v4384_v0 }
0x145a   : > { %v4386_v2 = vsel %vm3968_vm7, %v4385_v1, 0.0 }
0x145b   : > { %4387 = vadd.xlane.f32.xlu1 %v4386_v2 }
0x14e8   : > { %v4388_v6 = vpop.xlane.xlu1 %4387 }
0x14e9   : > { %v4389_v5 = vmul.f32 0.03125, %v4388_v6 }
0x14eb   : > { %v4390_v4 = vadd.f32 1e-05, %v4389_v5 }
0x14ed   : > { %5800 = vrsqrt.f32 %v4390_v4 }
0x14f7   : > { %v5801_v3 = vpop.eup %5800 }
0x14f8   : > { %v4392_v9 = vmul.f32 %v5801_v3, %v4384_v0 }
0x14fa   : > { %v4393_v12 = vmul.f32 %v4392_v9, %v4378_v7 }
0x14fc   : > { %v4394_v53 = vadd.f32 %v4393_v12, %v4379_v11 }
0x14fe   : > { %5313 = vmatmul.mubr.msk.f32.vlgmr.msra.gmra.mrb[2].mxu0 %vm846_vm1, %v4394_v53 }
0x15d1   : > { %v4469_v8 = vpop.f32.mrb[2].mxu0 }
0x15d2   : > { %v4470_v16 = vadd.f32 %v4469_v8, %v4399_v14  ;;  %v5314_v17 = vpop.f32.mrb[3].mxu0 }
0x15d4   : > { %4473 = vst.msk [vmem:[#allocation15 + $0x1] sm:$0x1] %vm4062_vm8, %v4470_v16 }
0x15d5 PF: > { %p5575_p7 = scmp.eq.s32.totalorder %s6220_s1, 1  ;;  %s6103_s2 = smov [#allocation15]  }
0x15d6   : > { %s4481_s25 = sshll.u32 %s6103_s2, 4  ;;  %s4482_s25 = int_to_ptr.vmem [resolvable:$true] %s4481_s25 }
0x15d7   : > { %s6004_s8 = scalar_lea.vmem %s4482_s25, 32  ;;  %p6011_p11 = scmp.lt.s32.totalorder %s4482_s25, %s4482_s25 }
0x15d8   : > { %p6005_p13 = scmp.ne.s32.totalorder %s4482_s25, %s6004_s8  ;;  %p6012_p4 = scmp.lt.s32.totalorder %s6004_s8, %s6004_s8 }
0x15da   : > { %p6006_p1 = pnand %p6005_p13, %p5575_p7  ;;  %p6013_p6 = por %p6012_p4, %p6011_p11 }
0x15dc   : > { %p6007_p10 = pneg %p6006_p1 }
0x15de   : > { %p6014_p12 = pnand %p6013_p6, %p6007_p10 }
0x15e0   : > { %6017 = shalt.err (!%p6014_p12)
}
0x15e1   : > { %s7158_s13 = sld [smem:[#allocation34_spill]] }
0x15e7   : > { %s6018_s24 = scalar_lea.hbm %s7158_s13, 32 }
0x15e8   : > { %p6019_p0 = scmp.ne.s32.totalorder %s7158_s13, %s6018_s24  ;;  %p6024_p3 = scmp.lt.u32.totalorder %s6018_s24, %s7158_s13 }
0x15ea   : > { %p6020_p5 = pnand %p6019_p0, %p5575_p7 }
0x15ec   : > { %p6021_p9 = pneg %p6020_p5 }
0x15ee   : > { %p6026_p2 = pnand %p6024_p3, %p6021_p9 }
0x15f0   : > { %6029 = shalt.err (!%p6026_p2)
}
0x15f1   : > { %5540 = dma.vmem_to_hbm [thread:$0]  (%p5575_p7), %s4482_s25, 32, %s7158_s13, [#allocation5]  }
0x15f2   : > { %6063 = dma.done.wait (%p5575_p7), [#allocation5], 32  }
0x15f3   : > { %6065 = vsyncadd (%p5575_p7), [#allocation5], 4294967264 }
0x15f4 PF: > { %s7159_s30 = sld [smem:[#allocation22_spill]]  ;;  %s7160_s0 = sld [smem:[#allocation21_spill]] }
0x15f5   : > { %s7161_s29 = sld [smem:[#allocation23_spill]]  ;;  %s7162_s27 = smov %s6072_s28 }
0x15fa   : > { %p34_p8 = scmp.ge.s32.totalorder %s7159_s30, 4   ;;  %s7163_s28 = smov %s7160_s0 }
0x15fc   :  { %36 = sbr.rel (!%p34_p8) target bundleno = 20 (0x14), region = 204 }
0x1603   :  { %4494 = vsyncpa [#allocation4], 1 }
0x1604   :  { %4496 = vsyncpa [#allocation4 + $0x1], 1 }
0x1605   :  { %4497 = vsyncpa [#allocation7], 1 }
0x1606   :  { %4499 = vsyncpa [#allocation7 + $0x1], 1 }
0x1607   :  { %4500 = vsyncpa [#allocation10], 1 }
0x1608   :  { %4501 = vsyncpa [#allocation13], 1 }
0x1609   :  { %4502 = vsyncpa [#allocation5], 1 }
0x160a   :  { %4504 = vsyncpa [#allocation5 + $0x1], 1 }

</bundles_post_ra>
